<compile_context>
chip_gen: v7x
topology: tpu7x:2x2x1
jax: 0.10.0
libtpu: 0.0.40
codegen_flags: <defaults>
</compile_context>

<pallas_src>
from functools import partial

import jax
import jax.numpy as jnp
import numpy as np
from jax import lax
from jax.experimental import pallas as pl
from jax.experimental.pallas import tpu as pltpu


def _pnet_kernel(alpha_ref,                     # SMEM (3,) PReLU alphas
                 p00, p01, p10, p11,            # (8, Lx) H/W-de-interleaved phases
                 wpk,                           # (32, 896) packed weights/biases
                 out_ref,                       # (8, L3): ch0 conf, ch1..4 offsets
                 *, wh, l1, l2, l3, cols):
    c_w1, c_w2, c_w3, c_wh, c_vec = cols
    a1, a2, a3 = alpha_ref[0], alpha_ref[1], alpha_ref[2]

    # ---- unpack the packed weight slab (static, 128-aligned column starts) ----
    w1m = wpk[0:16, c_w1:c_w1 + 72]             # conv1 im2col (16, 9*8)
    w2m = wpk[0:16, c_w2:c_w2 + 144]            # conv2 im2col (16, 9*16)
    w3m = wpk[0:32, c_w3:c_w3 + 144]            # conv3 im2col, BN2 folded (32, 9*16)
    whm = wpk[0:8, c_wh:c_wh + 32]              # fused 1x1 heads, BN3 folded (8, 32)
    b1 = wpk[0:16, c_vec + 0:c_vec + 1]
    s1 = wpk[0:16, c_vec + 1:c_vec + 2]
    t1 = wpk[0:16, c_vec + 2:c_vec + 3]
    b2 = wpk[0:16, c_vec + 3:c_vec + 4]
    b3 = wpk[0:32, c_vec + 4:c_vec + 5]
    bh = wpk[0:8, c_vec + 5:c_vec + 6]

    def prelu(v, a):
        return jnp.where(v >= 0.0, v, a * v)

    # ---- layer 1: conv3x3 + PReLU + BN1 + 2x2/2 max-pool ---------------------
    # 16 distinct taps (phase a,b x row/col offset u,v), each one global lane
    # slice of a de-interleaved phase array — loads hoisted, no row loop.
    phases = ((p00, p01), (p10, p11))
    taps = {}
    for pa in range(2):
        for pb in range(2):
            for u in range(2):
                for v in range(2):
                    off = u * wh + v
                    taps[(pa, u, pb, v)] = phases[pa][pb][:, off:off + l1]

    def l1_phase(rho, sig):
        # pooled-output phase (rho, sig): ONE (16, 72) @ (72, l1) MXU matmul
        patch = jnp.concatenate(
            [taps[((rho + dy) % 2, (rho + dy) // 2,
                   (sig + dx) % 2, (sig + dx) // 2)]
             for dy in range(3) for dx in range(3)], axis=0)   # (72, l1)
        y = jnp.dot(w1m, patch, preferred_element_type=jnp.float32) + b1
        return prelu(y, a1) * s1 + t1            # PReLU + BN1 (applied pre-pool)

    f1 = jnp.maximum(jnp.maximum(l1_phase(0, 0), l1_phase(0, 1)),
                     jnp.maximum(l1_phase(1, 0), l1_phase(1, 1)))   # (16, l1)

    # ---- whole-layer conv3x3 as ONE im2col matmul (all rows on lanes) --------
    def conv3x3(src, wmat, span):
        patch = jnp.concatenate(
            [src[:, dy * wh + dx:dy * wh + dx + span]
             for dy in range(3) for dx in range(3)], axis=0)   # (9*Cin, span)
        return jnp.dot(wmat, patch, preferred_element_type=jnp.float32)

    f2 = prelu(conv3x3(f1, w2m, l2) + b2, a2)                  # (16, l2)
    f3 = prelu(conv3x3(f2, w3m, l3) + b3, a3)                  # (32, l3)  BN2 folded

    # ---- fused 1x1 heads (BN3 folded), one lane-dense (8, l3) store ----------
    head = jnp.dot(whm, f3, preferred_element_type=jnp.float32) + bh
    ch = lax.broadcasted_iota(jnp.int32, head.shape, 0)
    out_ref[...] = jnp.where(ch == 0, jax.nn.sigmoid(head), head)


def pnet_forward(x_nchw, p, images_per_step=None):
    N, C, H, W = x_nchw.shape
    assert C == 3
    H1, W1 = H - 2, W - 2
    H1p, W1p = H1 // 2, W1 // 2
    H2, W2 = H1p - 2, W1p - 2
    H3, W3 = H2 - 2, W2 - 2
    assert H3 >= 1 and W3 >= 1, "input too small for PNet"
    Hh, Wh = H1p + 1, W1p + 1          # per-image phase block (1-row/col pad)
    simg = Hh * Wh                     # per-image lane stride

    # images per grid step: aim for ~1024 lanes per matmul (fewer, fatter steps)
    nb = images_per_step or max(1, min(N, max(1, 1024 // simg)))
    G = -(-N // nb)
    Npad = G * nb

    # lane lengths per layer (derived backwards from a 128-aligned output slab)
    last_valid = (nb - 1) * simg + (H3 - 1) * Wh + (W3 - 1)
    L3 = ((last_valid + 1 + 127) // 128) * 128
    L2 = L3 + 2 * Wh + 2
    L1 = L2 + 2 * Wh + 2
    Lx = ((max(L1 + Wh + 1, nb * simg) + 127) // 128) * 128

    # ---- input: NCHW -> 4 H/W-de-interleaved phases, images packed on lanes ---
    x = x_nchw.astype(jnp.float32)
    if Npad > N:
        x = jnp.pad(x, ((0, Npad - N), (0, 0), (0, 0), (0, 0)))
    x = jnp.pad(x, ((0, 0), (0, 5), (0, 0), (0, 0)))            # C: 3 -> 8 sublanes

    def make_phase(a, b):
        ph = x[:, :, a::2, b::2][:, :, :Hh, :Wh]                # (Npad, 8, Hh, Wh)
        ph = ph.reshape(G, nb, 8, Hh, Wh).transpose(0, 2, 1, 3, 4)
        ph = ph.reshape(G, 8, nb * simg)
        return jnp.pad(ph, ((0, 0), (0, 0), (0, Lx - nb * simg)))

    ph00, ph01, ph10, ph11 = [make_phase(a, b) for a in range(2) for b in range(2)]

    # ---- host-side weight packing / BN folding (padded channels stay exact 0) -
    def pad_to(a, axis, n):
        padw = [(0, 0)] * a.ndim
        padw[axis] = (0, n - a.shape[axis])
        return jnp.pad(a, padw)

    # conv1: HWIO (3,3,3,10) -> (16, 9*8), K rows ordered (dy, dx, ci)
    w1 = pad_to(pad_to(jnp.transpose(p['w1'], (3, 0, 1, 2)), 0, 16), 3, 8)
    w1m = w1.reshape(16, 72)
    # conv2: (3,3,10,16) -> (16, 9*16) (input channels zero-padded 10 -> 16)
    w2m = pad_to(jnp.transpose(p['w2'], (3, 0, 1, 2)), 3, 16).reshape(16, 144)
    # conv3 with BN2 folded: w3' = w3*s2[ci]; b3' = b3 + sum_taps(w3*t2[ci])
    w3 = jnp.transpose(p['w3'], (3, 0, 1, 2))                    # (32,3,3,16)
    w3m = (w3 * p['s2'][None, None, None, :]).reshape(32, 144)
    b3 = p['b3'] + jnp.sum(w3 * p['t2'][None, None, None, :], axis=(1, 2, 3))
    # fused 1x1 heads with BN3 folded, padded to 8 output channels (pad rows = 0)
    whead = jnp.concatenate([p['wc'], p['wo']], axis=1).T        # (5, 32)
    bhead = jnp.concatenate([p['bc'], p['bo']]) + whead @ p['t3']
    whm = pad_to(whead * p['s3'][None, :], 0, 8)                 # (8, 32)
    bh = pad_to(bhead, 0, 8)

    # single packed weight slab (128-aligned column starts -> cheap unpack)
    C_W1, C_W2, C_W3, C_WH, C_VEC = 0, 128, 384, 640, 768
    WPK = 896
    wpk = jnp.zeros((32, WPK), jnp.float32)
    wpk = wpk.at[0:16, C_W1:C_W1 + 72].set(w1m)
    wpk = wpk.at[0:16, C_W2:C_W2 + 144].set(w2m)
    wpk = wpk.at[0:32, C_W3:C_W3 + 144].set(w3m)
    wpk = wpk.at[0:8, C_WH:C_WH + 32].set(whm)
    wpk = wpk.at[0:16, C_VEC + 0].set(pad_to(p['b1'], 0, 16))
    wpk = wpk.at[0:16, C_VEC + 1].set(pad_to(p['s1'], 0, 16))
    wpk = wpk.at[0:16, C_VEC + 2].set(pad_to(p['t1'], 0, 16))
    wpk = wpk.at[0:16, C_VEC + 3].set(p['b2'])
    wpk = wpk.at[0:32, C_VEC + 4].set(b3)
    wpk = wpk.at[0:8, C_VEC + 5].set(bh)

    kernel = partial(_pnet_kernel, wh=Wh, l1=L1, l2=L2, l3=L3,
                     cols=(C_W1, C_W2, C_W3, C_WH, C_VEC))

    x_spec = pl.BlockSpec((None, 8, Lx), lambda g: (g, 0, 0))
    grid_spec = pltpu.PrefetchScalarGridSpec(
        num_scalar_prefetch=0,
        grid=(G,),
        in_specs=[pl.BlockSpec(memory_space=pltpu.MemorySpace.SMEM),
                  x_spec, x_spec, x_spec, x_spec,
                  pl.BlockSpec((32, WPK), lambda g: (0, 0))],
        out_specs=pl.BlockSpec((None, 8, L3), lambda g: (g, 0, 0)),
    )

    out = pl.pallas_call(
        kernel,
        out_shape=jax.ShapeDtypeStruct((G, 8, L3), jnp.float32),
        grid_spec=grid_spec,
        compiler_params=pltpu.CompilerParams(
            dimension_semantics=("parallel",),       # batch blocks across TCs
            vmem_limit_bytes=32 * 1024 * 1024),
    )(p['alphas'], ph00, ph01, ph10, ph11, wpk)

    # ---- unflatten lanes -> (image, row, col), strip don't-care padding -------
    nbhw = nb * simg
    if L3 >= nbhw:
        full = out[:, :, :nbhw]
    else:
        full = jnp.pad(out, ((0, 0), (0, 0), (0, nbhw - L3)))
    full = full.reshape(G, 8, nb, Hh, Wh).transpose(0, 2, 1, 3, 4)
    full = full.reshape(Npad, 8, Hh, Wh)[:N, :, :H3, :W3]
    return full[:, 0:1], full[:, 1:5]                 # confidence, offsets (NCHW)


def init_params(key):
    """Deterministic synthetic parameters (shapes per PNet.__init__), BN folded."""
    ks = jax.random.split(key, 32)
    eps = 1e-5

    def nrm(k, shape, scale=0.1):
        return scale * jax.random.normal(k, shape, jnp.float32)

    def bn_fold(kg, kb, km, kv, c):
        gamma = 1.0 + nrm(kg, (c,))
        beta = nrm(kb, (c,))
        mean = nrm(km, (c,))
        var = 1.0 + 0.2 * jax.random.uniform(kv, (c,), jnp.float32)
        s = gamma / jnp.sqrt(var + eps)
        return s, beta - mean * s

    p = {}
    p['w1'] = nrm(ks[0], (3, 3, 3, 10));   p['b1'] = nrm(ks[1], (10,))
    p['s1'], p['t1'] = bn_fold(ks[2], ks[3], ks[4], ks[5], 10)
    p['w2'] = nrm(ks[6], (3, 3, 10, 16));  p['b2'] = nrm(ks[7], (16,))
    p['s2'], p['t2'] = bn_fold(ks[8], ks[9], ks[10], ks[11], 16)
    p['w3'] = nrm(ks[12], (3, 3, 16, 32)); p['b3'] = nrm(ks[13], (32,))
    p['s3'], p['t3'] = bn_fold(ks[14], ks[15], ks[16], ks[17], 32)
    p['wc'] = nrm(ks[18], (32, 1));        p['bc'] = nrm(ks[19], (1,))
    p['wo'] = nrm(ks[20], (32, 4));        p['bo'] = nrm(ks[21], (4,))
    p['alphas'] = jnp.array([0.25, 0.25, 0.25], jnp.float32)  # PReLU default init
    return p


def pnet_ref(x_nchw, p):
    """Pure-JAX reference (same math, XLA conv) for correctness checking."""
    x = jnp.transpose(x_nchw, (0, 2, 3, 1)).astype(jnp.float32)

    def conv(x, w, b):
        y = lax.conv_general_dilated(
            x, w, (1, 1), 'VALID',
            dimension_numbers=('NHWC', 'HWIO', 'NHWC'),
            precision=lax.Precision.HIGHEST)
        return y + b

    def prelu(v, a):
        return jnp.where(v >= 0, v, a * v)

    y = conv(x, p['w1'], p['b1']); y = prelu(y, p['alphas'][0]); y = y * p['s1'] + p['t1']
    y = lax.reduce_window(y, -jnp.inf, lax.max, (1, 2, 2, 1), (1, 2, 2, 1), 'VALID')
    y = conv(y, p['w2'], p['b2']); y = prelu(y, p['alphas'][1]); y = y * p['s2'] + p['t2']
    y = conv(y, p['w3'], p['b3']); y = prelu(y, p['alphas'][2]); y = y * p['s3'] + p['t3']
    conf = jax.nn.sigmoid(conv(y, p['wc'].reshape(1, 1, 32, 1), p['bc']))
    off = conv(y, p['wo'].reshape(1, 1, 32, 4), p['bo'])
    return jnp.transpose(conf, (0, 3, 1, 2)), jnp.transpose(off, (0, 3, 1, 2))


if __name__ == "__main__":
    key = jax.random.PRNGKey(0)
    kx, kp = jax.random.split(key)
    params = init_params(kp)
    x = jax.random.normal(kx, (2, 3, 16, 16), jnp.float32)   # NCHW like PyTorch

    conf, off = jax.block_until_ready(pnet_forward(x, params))
    assert conf.shape == (2, 1, 3, 3) and off.shape == (2, 4, 3, 3)

    conf_r, off_r = pnet_ref(x, params)
    # NOTE: 2e-3 tolerance is intentional — in-kernel f32 dots run at default
    # (bf16-pass) MXU precision vs the HIGHEST-precision XLA reference.
    np.testing.assert_allclose(np.asarray(conf), np.asarray(conf_r), rtol=2e-3, atol=2e-3)
    np.testing.assert_allclose(np.asarray(off), np.asarray(off_r), rtol=2e-3, atol=2e-3)

    print("KERNEL_OK")
</pallas_src>

<mosaic_0001>
module attributes {stable_mosaic.version = 11 : i64} {
  func.func @_pnet_kernel(%arg0: i32, %arg1: memref<3xf32, #tpu.memory_space<smem>>, %arg2: memref<1x8x256xf32, #tpu.memory_space<vmem>>, %arg3: memref<1x8x256xf32, #tpu.memory_space<vmem>>, %arg4: memref<1x8x256xf32, #tpu.memory_space<vmem>>, %arg5: memref<1x8x256xf32, #tpu.memory_space<vmem>>, %arg6: memref<32x896xf32, #tpu.memory_space<vmem>>, %arg7: memref<1x8x128xf32, #tpu.memory_space<vmem>>) attributes {dimension_semantics = [#tpu.dimension_semantics<parallel>], iteration_bounds = array<i64: 1>, scalar_prefetch = 0 : i64, scratch_operands = 0 : i64, tpu.core_type = #tpu.core_type<tc>, window_params = [{transform_indices = @transform_0, window_bounds = array<i64: 3>}, {transform_indices = @transform_1, window_bounds = array<i64: 1, 8, 256>}, {transform_indices = @transform_2, window_bounds = array<i64: 1, 8, 256>}, {transform_indices = @transform_3, window_bounds = array<i64: 1, 8, 256>}, {transform_indices = @transform_4, window_bounds = array<i64: 1, 8, 256>}, {pipeline_mode = #tpu.pipeline_mode<synchronous>, transform_indices = @transform_5, window_bounds = array<i64: 32, 896>}, {transform_indices = @transform_6, window_bounds = array<i64: 1, 8, 128>}]} {
    %c0 = arith.constant 0 : index
    %0 = memref.load %arg1[%c0] : memref<3xf32, #tpu.memory_space<smem>>
    %c1 = arith.constant 1 : index
    %1 = memref.load %arg1[%c1] : memref<3xf32, #tpu.memory_space<smem>>
    %c2 = arith.constant 2 : index
    %2 = memref.load %arg1[%c2] : memref<3xf32, #tpu.memory_space<smem>>
    %c0_0 = arith.constant 0 : index
    %c0_1 = arith.constant 0 : index
    %3 = vector.load %arg6[%c0_0, %c0_1] : memref<32x896xf32, #tpu.memory_space<vmem>>, vector<16x72xf32>
    %c0_2 = arith.constant 0 : index
    %c128 = arith.constant 128 : index
    %4 = vector.load %arg6[%c0_2, %c128] : memref<32x896xf32, #tpu.memory_space<vmem>>, vector<16x144xf32>
    %c0_3 = arith.constant 0 : index
    %c384 = arith.constant 384 : index
    %5 = vector.load %arg6[%c0_3, %c384] : memref<32x896xf32, #tpu.memory_space<vmem>>, vector<32x144xf32>
    %c0_4 = arith.constant 0 : index
    %c640 = arith.constant 640 : index
    %6 = vector.load %arg6[%c0_4, %c640] : memref<32x896xf32, #tpu.memory_space<vmem>>, vector<8x32xf32>
    %c0_5 = arith.constant 0 : index
    %c768 = arith.constant 768 : index
    %7 = vector.load %arg6[%c0_5, %c768] : memref<32x896xf32, #tpu.memory_space<vmem>>, vector<16x1xf32>
    %c0_6 = arith.constant 0 : index
    %c769 = arith.constant 769 : index
    %8 = vector.load %arg6[%c0_6, %c769] : memref<32x896xf32, #tpu.memory_space<vmem>>, vector<16x1xf32>
    %c0_7 = arith.constant 0 : index
    %c770 = arith.constant 770 : index
    %9 = vector.load %arg6[%c0_7, %c770] : memref<32x896xf32, #tpu.memory_space<vmem>>, vector<16x1xf32>
    %c0_8 = arith.constant 0 : index
    %c771 = arith.constant 771 : index
    %10 = vector.load %arg6[%c0_8, %c771] : memref<32x896xf32, #tpu.memory_space<vmem>>, vector<16x1xf32>
    %c0_9 = arith.constant 0 : index
    %c772 = arith.constant 772 : index
    %11 = vector.load %arg6[%c0_9, %c772] : memref<32x896xf32, #tpu.memory_space<vmem>>, vector<32x1xf32>
    %c0_10 = arith.constant 0 : index
    %c773 = arith.constant 773 : index
    %12 = vector.load %arg6[%c0_10, %c773] : memref<32x896xf32, #tpu.memory_space<vmem>>, vector<8x1xf32>
    %c0_11 = arith.constant 0 : index
    %c0_12 = arith.constant 0 : index
    %c0_13 = arith.constant 0 : index
    %13 = vector.load %arg2[%c0_11, %c0_12, %c0_13] : memref<1x8x256xf32, #tpu.memory_space<vmem>>, vector<1x8x164xf32>
    %14 = vector.shape_cast %13 : vector<1x8x164xf32> to vector<8x164xf32>
    %c0_14 = arith.constant 0 : index
    %c0_15 = arith.constant 0 : index
    %c1_16 = arith.constant 1 : index
    %15 = vector.load %arg2[%c0_14, %c0_15, %c1_16] : memref<1x8x256xf32, #tpu.memory_space<vmem>>, vector<1x8x164xf32>
    %16 = vector.shape_cast %15 : vector<1x8x164xf32> to vector<8x164xf32>
    %c0_17 = arith.constant 0 : index
    %c0_18 = arith.constant 0 : index
    %c8 = arith.constant 8 : index
    %17 = vector.load %arg2[%c0_17, %c0_18, %c8] : memref<1x8x256xf32, #tpu.memory_space<vmem>>, vector<1x8x164xf32>
    %18 = vector.shape_cast %17 : vector<1x8x164xf32> to vector<8x164xf32>
    %c0_19 = arith.constant 0 : index
    %c0_20 = arith.constant 0 : index
    %c9 = arith.constant 9 : index
    %19 = vector.load %arg2[%c0_19, %c0_20, %c9] : memref<1x8x256xf32, #tpu.memory_space<vmem>>, vector<1x8x164xf32>
    %20 = vector.shape_cast %19 : vector<1x8x164xf32> to vector<8x164xf32>
    %c0_21 = arith.constant 0 : index
    %c0_22 = arith.constant 0 : index
    %c0_23 = arith.constant 0 : index
    %21 = vector.load %arg3[%c0_21, %c0_22, %c0_23] : memref<1x8x256xf32, #tpu.memory_space<vmem>>, vector<1x8x164xf32>
    %22 = vector.shape_cast %21 : vector<1x8x164xf32> to vector<8x164xf32>
    %c0_24 = arith.constant 0 : index
    %c0_25 = arith.constant 0 : index
    %c1_26 = arith.constant 1 : index
    %23 = vector.load %arg3[%c0_24, %c0_25, %c1_26] : memref<1x8x256xf32, #tpu.memory_space<vmem>>, vector<1x8x164xf32>
    %24 = vector.shape_cast %23 : vector<1x8x164xf32> to vector<8x164xf32>
    %c0_27 = arith.constant 0 : index
    %c0_28 = arith.constant 0 : index
    %c8_29 = arith.constant 8 : index
    %25 = vector.load %arg3[%c0_27, %c0_28, %c8_29] : memref<1x8x256xf32, #tpu.memory_space<vmem>>, vector<1x8x164xf32>
    %26 = vector.shape_cast %25 : vector<1x8x164xf32> to vector<8x164xf32>
    %c0_30 = arith.constant 0 : index
    %c0_31 = arith.constant 0 : index
    %c9_32 = arith.constant 9 : index
    %27 = vector.load %arg3[%c0_30, %c0_31, %c9_32] : memref<1x8x256xf32, #tpu.memory_space<vmem>>, vector<1x8x164xf32>
    %28 = vector.shape_cast %27 : vector<1x8x164xf32> to vector<8x164xf32>
    %c0_33 = arith.constant 0 : index
    %c0_34 = arith.constant 0 : index
    %c0_35 = arith.constant 0 : index
    %29 = vector.load %arg4[%c0_33, %c0_34, %c0_35] : memref<1x8x256xf32, #tpu.memory_space<vmem>>, vector<1x8x164xf32>
    %30 = vector.shape_cast %29 : vector<1x8x164xf32> to vector<8x164xf32>
    %c0_36 = arith.constant 0 : index
    %c0_37 = arith.constant 0 : index
    %c1_38 = arith.constant 1 : index
    %31 = vector.load %arg4[%c0_36, %c0_37, %c1_38] : memref<1x8x256xf32, #tpu.memory_space<vmem>>, vector<1x8x164xf32>
    %32 = vector.shape_cast %31 : vector<1x8x164xf32> to vector<8x164xf32>
    %c0_39 = arith.constant 0 : index
    %c0_40 = arith.constant 0 : index
    %c8_41 = arith.constant 8 : index
    %33 = vector.load %arg4[%c0_39, %c0_40, %c8_41] : memref<1x8x256xf32, #tpu.memory_space<vmem>>, vector<1x8x164xf32>
    %34 = vector.shape_cast %33 : vector<1x8x164xf32> to vector<8x164xf32>
    %c0_42 = arith.constant 0 : index
    %c0_43 = arith.constant 0 : index
    %c9_44 = arith.constant 9 : index
    %35 = vector.load %arg4[%c0_42, %c0_43, %c9_44] : memref<1x8x256xf32, #tpu.memory_space<vmem>>, vector<1x8x164xf32>
    %36 = vector.shape_cast %35 : vector<1x8x164xf32> to vector<8x164xf32>
    %c0_45 = arith.constant 0 : index
    %c0_46 = arith.constant 0 : index
    %c0_47 = arith.constant 0 : index
    %37 = vector.load %arg5[%c0_45, %c0_46, %c0_47] : memref<1x8x256xf32, #tpu.memory_space<vmem>>, vector<1x8x164xf32>
    %38 = vector.shape_cast %37 : vector<1x8x164xf32> to vector<8x164xf32>
    %c0_48 = arith.constant 0 : index
    %c0_49 = arith.constant 0 : index
    %c1_50 = arith.constant 1 : index
    %39 = vector.load %arg5[%c0_48, %c0_49, %c1_50] : memref<1x8x256xf32, #tpu.memory_space<vmem>>, vector<1x8x164xf32>
    %40 = vector.shape_cast %39 : vector<1x8x164xf32> to vector<8x164xf32>
    %c0_51 = arith.constant 0 : index
    %c0_52 = arith.constant 0 : index
    %c8_53 = arith.constant 8 : index
    %41 = vector.load %arg5[%c0_51, %c0_52, %c8_53] : memref<1x8x256xf32, #tpu.memory_space<vmem>>, vector<1x8x164xf32>
    %42 = vector.shape_cast %41 : vector<1x8x164xf32> to vector<8x164xf32>
    %c0_54 = arith.constant 0 : index
    %c0_55 = arith.constant 0 : index
    %c9_56 = arith.constant 9 : index
    %43 = vector.load %arg5[%c0_54, %c0_55, %c9_56] : memref<1x8x256xf32, #tpu.memory_space<vmem>>, vector<1x8x164xf32>
    %44 = vector.shape_cast %43 : vector<1x8x164xf32> to vector<8x164xf32>
    %45 = tpu.concatenate %14, %22, %16, %30, %38, %32, %18, %26, %20 in 0 : vector<8x164xf32>, vector<8x164xf32>, vector<8x164xf32>, vector<8x164xf32>, vector<8x164xf32>, vector<8x164xf32>, vector<8x164xf32>, vector<8x164xf32>, vector<8x164xf32> -> vector<72x164xf32>
    %cst = arith.constant dense<0.000000e+00> : vector<16x164xf32>
    %46 = tpu.matmul %3, %45, %cst {dimension_numbers = #tpu.dot_dimension_numbers<[1], [0], [0], [1], [0, 0, 1, 1], [], []>} : vector<16x72xf32>, vector<72x164xf32>, vector<16x164xf32> -> vector<16x164xf32>
    %47 = vector.broadcast %7 : vector<16x1xf32> to vector<16x164xf32>
    %48 = arith.addf %46, %47 : vector<16x164xf32>
    %cst_57 = arith.constant 0.000000e+00 : f32
    %49 = vector.broadcast %cst_57 : f32 to vector<16x164xf32>
    %50 = arith.cmpf oge, %48, %49 : vector<16x164xf32>
    %51 = vector.broadcast %0 : f32 to vector<16x164xf32>
    %52 = arith.mulf %51, %48 : vector<16x164xf32>
    %53 = arith.select %50, %48, %52 : vector<16x164xi1>, vector<16x164xf32>
    %54 = vector.broadcast %8 : vector<16x1xf32> to vector<16x164xf32>
    %55 = arith.mulf %53, %54 : vector<16x164xf32>
    %56 = vector.broadcast %9 : vector<16x1xf32> to vector<16x164xf32>
    %57 = arith.addf %55, %56 : vector<16x164xf32>
    %58 = tpu.concatenate %22, %16, %24, %38, %32, %40, %26, %20, %28 in 0 : vector<8x164xf32>, vector<8x164xf32>, vector<8x164xf32>, vector<8x164xf32>, vector<8x164xf32>, vector<8x164xf32>, vector<8x164xf32>, vector<8x164xf32>, vector<8x164xf32> -> vector<72x164xf32>
    %cst_58 = arith.constant dense<0.000000e+00> : vector<16x164xf32>
    %59 = tpu.matmul %3, %58, %cst_58 {dimension_numbers = #tpu.dot_dimension_numbers<[1], [0], [0], [1], [0, 0, 1, 1], [], []>} : vector<16x72xf32>, vector<72x164xf32>, vector<16x164xf32> -> vector<16x164xf32>
    %60 = vector.broadcast %7 : vector<16x1xf32> to vector<16x164xf32>
    %61 = arith.addf %59, %60 : vector<16x164xf32>
    %cst_59 = arith.constant 0.000000e+00 : f32
    %62 = vector.broadcast %cst_59 : f32 to vector<16x164xf32>
    %63 = arith.cmpf oge, %61, %62 : vector<16x164xf32>
    %64 = vector.broadcast %0 : f32 to vector<16x164xf32>
    %65 = arith.mulf %64, %61 : vector<16x164xf32>
    %66 = arith.select %63, %61, %65 : vector<16x164xi1>, vector<16x164xf32>
    %67 = vector.broadcast %8 : vector<16x1xf32> to vector<16x164xf32>
    %68 = arith.mulf %66, %67 : vector<16x164xf32>
    %69 = vector.broadcast %9 : vector<16x1xf32> to vector<16x164xf32>
    %70 = arith.addf %68, %69 : vector<16x164xf32>
    %71 = arith.maximumf %57, %70 : vector<16x164xf32>
    %72 = tpu.concatenate %30, %38, %32, %18, %26, %20, %34, %42, %36 in 0 : vector<8x164xf32>, vector<8x164xf32>, vector<8x164xf32>, vector<8x164xf32>, vector<8x164xf32>, vector<8x164xf32>, vector<8x164xf32>, vector<8x164xf32>, vector<8x164xf32> -> vector<72x164xf32>
    %cst_60 = arith.constant dense<0.000000e+00> : vector<16x164xf32>
    %73 = tpu.matmul %3, %72, %cst_60 {dimension_numbers = #tpu.dot_dimension_numbers<[1], [0], [0], [1], [0, 0, 1, 1], [], []>} : vector<16x72xf32>, vector<72x164xf32>, vector<16x164xf32> -> vector<16x164xf32>
    %74 = vector.broadcast %7 : vector<16x1xf32> to vector<16x164xf32>
    %75 = arith.addf %73, %74 : vector<16x164xf32>
    %cst_61 = arith.constant 0.000000e+00 : f32
    %76 = vector.broadcast %cst_61 : f32 to vector<16x164xf32>
    %77 = arith.cmpf oge, %75, %76 : vector<16x164xf32>
    %78 = vector.broadcast %0 : f32 to vector<16x164xf32>
    %79 = arith.mulf %78, %75 : vector<16x164xf32>
    %80 = arith.select %77, %75, %79 : vector<16x164xi1>, vector<16x164xf32>
    %81 = vector.broadcast %8 : vector<16x1xf32> to vector<16x164xf32>
    %82 = arith.mulf %80, %81 : vector<16x164xf32>
    %83 = vector.broadcast %9 : vector<16x1xf32> to vector<16x164xf32>
    %84 = arith.addf %82, %83 : vector<16x164xf32>
    %85 = tpu.concatenate %38, %32, %40, %26, %20, %28, %42, %36, %44 in 0 : vector<8x164xf32>, vector<8x164xf32>, vector<8x164xf32>, vector<8x164xf32>, vector<8x164xf32>, vector<8x164xf32>, vector<8x164xf32>, vector<8x164xf32>, vector<8x164xf32> -> vector<72x164xf32>
    %cst_62 = arith.constant dense<0.000000e+00> : vector<16x164xf32>
    %86 = tpu.matmul %3, %85, %cst_62 {dimension_numbers = #tpu.dot_dimension_numbers<[1], [0], [0], [1], [0, 0, 1, 1], [], []>} : vector<16x72xf32>, vector<72x164xf32>, vector<16x164xf32> -> vector<16x164xf32>
    %87 = vector.broadcast %7 : vector<16x1xf32> to vector<16x164xf32>
    %88 = arith.addf %86, %87 : vector<16x164xf32>
    %cst_63 = arith.constant 0.000000e+00 : f32
    %89 = vector.broadcast %cst_63 : f32 to vector<16x164xf32>
    %90 = arith.cmpf oge, %88, %89 : vector<16x164xf32>
    %91 = vector.broadcast %0 : f32 to vector<16x164xf32>
    %92 = arith.mulf %91, %88 : vector<16x164xf32>
    %93 = arith.select %90, %88, %92 : vector<16x164xi1>, vector<16x164xf32>
    %94 = vector.broadcast %8 : vector<16x1xf32> to vector<16x164xf32>
    %95 = arith.mulf %93, %94 : vector<16x164xf32>
    %96 = vector.broadcast %9 : vector<16x1xf32> to vector<16x164xf32>
    %97 = arith.addf %95, %96 : vector<16x164xf32>
    %98 = arith.maximumf %84, %97 : vector<16x164xf32>
    %99 = arith.maximumf %71, %98 : vector<16x164xf32>
    %100 = vector.extract_strided_slice %99 {offsets = [0, 0], sizes = [16, 146], strides = [1, 1]} : vector<16x164xf32> to vector<16x146xf32>
    %101 = vector.extract_strided_slice %99 {offsets = [0, 1], sizes = [16, 146], strides = [1, 1]} : vector<16x164xf32> to vector<16x146xf32>
    %102 = vector.extract_strided_slice %99 {offsets = [0, 2], sizes = [16, 146], strides = [1, 1]} : vector<16x164xf32> to vector<16x146xf32>
    %103 = vector.extract_strided_slice %99 {offsets = [0, 8], sizes = [16, 146], strides = [1, 1]} : vector<16x164xf32> to vector<16x146xf32>
    %104 = vector.extract_strided_slice %99 {offsets = [0, 9], sizes = [16, 146], strides = [1, 1]} : vector<16x164xf32> to vector<16x146xf32>
    %105 = vector.extract_strided_slice %99 {offsets = [0, 10], sizes = [16, 146], strides = [1, 1]} : vector<16x164xf32> to vector<16x146xf32>
    %106 = vector.extract_strided_slice %99 {offsets = [0, 16], sizes = [16, 146], strides = [1, 1]} : vector<16x164xf32> to vector<16x146xf32>
    %107 = vector.extract_strided_slice %99 {offsets = [0, 17], sizes = [16, 146], strides = [1, 1]} : vector<16x164xf32> to vector<16x146xf32>
    %108 = vector.extract_strided_slice %99 {offsets = [0, 18], sizes = [16, 146], strides = [1, 1]} : vector<16x164xf32> to vector<16x146xf32>
    %109 = tpu.concatenate %100, %101, %102, %103, %104, %105, %106, %107, %108 in 0 : vector<16x146xf32>, vector<16x146xf32>, vector<16x146xf32>, vector<16x146xf32>, vector<16x146xf32>, vector<16x146xf32>, vector<16x146xf32>, vector<16x146xf32>, vector<16x146xf32> -> vector<144x146xf32>
    %cst_64 = arith.constant dense<0.000000e+00> : vector<16x146xf32>
    %110 = tpu.matmul %4, %109, %cst_64 {dimension_numbers = #tpu.dot_dimension_numbers<[1], [0], [0], [1], [0, 0, 1, 1], [], []>} : vector<16x144xf32>, vector<144x146xf32>, vector<16x146xf32> -> vector<16x146xf32>
    %111 = vector.broadcast %10 : vector<16x1xf32> to vector<16x146xf32>
    %112 = arith.addf %110, %111 : vector<16x146xf32>
    %cst_65 = arith.constant 0.000000e+00 : f32
    %113 = vector.broadcast %cst_65 : f32 to vector<16x146xf32>
    %114 = arith.cmpf oge, %112, %113 : vector<16x146xf32>
    %115 = vector.broadcast %1 : f32 to vector<16x146xf32>
    %116 = arith.mulf %115, %112 : vector<16x146xf32>
    %117 = arith.select %114, %112, %116 : vector<16x146xi1>, vector<16x146xf32>
    %118 = vector.extract_strided_slice %117 {offsets = [0, 0], sizes = [16, 128], strides = [1, 1]} : vector<16x146xf32> to vector<16x128xf32>
    %119 = vector.extract_strided_slice %117 {offsets = [0, 1], sizes = [16, 128], strides = [1, 1]} : vector<16x146xf32> to vector<16x128xf32>
    %120 = vector.extract_strided_slice %117 {offsets = [0, 2], sizes = [16, 128], strides = [1, 1]} : vector<16x146xf32> to vector<16x128xf32>
    %121 = vector.extract_strided_slice %117 {offsets = [0, 8], sizes = [16, 128], strides = [1, 1]} : vector<16x146xf32> to vector<16x128xf32>
    %122 = vector.extract_strided_slice %117 {offsets = [0, 9], sizes = [16, 128], strides = [1, 1]} : vector<16x146xf32> to vector<16x128xf32>
    %123 = vector.extract_strided_slice %117 {offsets = [0, 10], sizes = [16, 128], strides = [1, 1]} : vector<16x146xf32> to vector<16x128xf32>
    %124 = vector.extract_strided_slice %117 {offsets = [0, 16], sizes = [16, 128], strides = [1, 1]} : vector<16x146xf32> to vector<16x128xf32>
    %125 = vector.extract_strided_slice %117 {offsets = [0, 17], sizes = [16, 128], strides = [1, 1]} : vector<16x146xf32> to vector<16x128xf32>
    %126 = vector.extract_strided_slice %117 {offsets = [0, 18], sizes = [16, 128], strides = [1, 1]} : vector<16x146xf32> to vector<16x128xf32>
    %127 = tpu.concatenate %118, %119, %120, %121, %122, %123, %124, %125, %126 in 0 : vector<16x128xf32>, vector<16x128xf32>, vector<16x128xf32>, vector<16x128xf32>, vector<16x128xf32>, vector<16x128xf32>, vector<16x128xf32>, vector<16x128xf32>, vector<16x128xf32> -> vector<144x128xf32>
    %cst_66 = arith.constant dense<0.000000e+00> : vector<32x128xf32>
    %128 = tpu.matmul %5, %127, %cst_66 {dimension_numbers = #tpu.dot_dimension_numbers<[1], [0], [0], [1], [0, 0, 1, 1], [], []>} : vector<32x144xf32>, vector<144x128xf32>, vector<32x128xf32> -> vector<32x128xf32>
    %129 = vector.broadcast %11 : vector<32x1xf32> to vector<32x128xf32>
    %130 = arith.addf %128, %129 : vector<32x128xf32>
    %cst_67 = arith.constant 0.000000e+00 : f32
    %131 = vector.broadcast %cst_67 : f32 to vector<32x128xf32>
    %132 = arith.cmpf oge, %130, %131 : vector<32x128xf32>
    %133 = vector.broadcast %2 : f32 to vector<32x128xf32>
    %134 = arith.mulf %133, %130 : vector<32x128xf32>
    %135 = arith.select %132, %130, %134 : vector<32x128xi1>, vector<32x128xf32>
    %cst_68 = arith.constant dense<0.000000e+00> : vector<8x128xf32>
    %136 = tpu.matmul %6, %135, %cst_68 {dimension_numbers = #tpu.dot_dimension_numbers<[1], [0], [0], [1], [0, 0, 1, 1], [], []>} : vector<8x32xf32>, vector<32x128xf32>, vector<8x128xf32> -> vector<8x128xf32>
    %137 = vector.broadcast %12 : vector<8x1xf32> to vector<8x128xf32>
    %138 = arith.addf %136, %137 : vector<8x128xf32>
    %139 = tpu.iota {dimensions = array<i32: 0>} : vector<8x128xi32>
    %c0_i32 = arith.constant 0 : i32
    %140 = vector.broadcast %c0_i32 : i32 to vector<8x128xi32>
    %141 = arith.cmpi eq, %139, %140 : vector<8x128xi32>
    %142 = arith.negf %138 : vector<8x128xf32>
    %143 = math.exp %142 : vector<8x128xf32>
    %cst_69 = arith.constant 1.000000e+00 : f32
    %144 = vector.broadcast %cst_69 : f32 to vector<8x128xf32>
    %145 = arith.addf %144, %143 : vector<8x128xf32>
    %146 = arith.divf %144, %145 : vector<8x128xf32>
    %147 = arith.select %141, %146, %138 : vector<8x128xi1>, vector<8x128xf32>
    %c0_70 = arith.constant 0 : index
    %c0_71 = arith.constant 0 : index
    %c0_72 = arith.constant 0 : index
    %148 = vector.load %arg7[%c0_70, %c0_71, %c0_72] : memref<1x8x128xf32, #tpu.memory_space<vmem>>, vector<1x8x128xf32>
    %149 = vector.shape_cast %148 : vector<1x8x128xf32> to vector<8x128xf32>
    %150 = vector.shape_cast %147 : vector<8x128xf32> to vector<1x8x128xf32>
    tpu.vector_store %arg7[%c0_70, %c0_71, %c0_72], %150 {strides = array<i32>} : memref<1x8x128xf32, #tpu.memory_space<vmem>>, vector<1x8x128xf32>,
    return
  }
  func.func @transform_0(%arg0: i32) -> i32 {
    %c0_i32 = arith.constant 0 : i32
    %c0_i32_0 = arith.constant 0 : i32
    return %c0_i32 : i32
  }
  func.func @transform_1(%arg0: i32) -> (i32, i32, i32) {
    %c0_i32 = arith.constant 0 : i32
    %c0_i32_0 = arith.constant 0 : i32
    %c0_i32_1 = arith.constant 0 : i32
    return %arg0, %c0_i32, %c0_i32_0 : i32, i32, i32
  }
  func.func @transform_2(%arg0: i32) -> (i32, i32, i32) {
    %c0_i32 = arith.constant 0 : i32
    %c0_i32_0 = arith.constant 0 : i32
    %c0_i32_1 = arith.constant 0 : i32
    return %arg0, %c0_i32, %c0_i32_0 : i32, i32, i32
  }
  func.func @transform_3(%arg0: i32) -> (i32, i32, i32) {
    %c0_i32 = arith.constant 0 : i32
    %c0_i32_0 = arith.constant 0 : i32
    %c0_i32_1 = arith.constant 0 : i32
    return %arg0, %c0_i32, %c0_i32_0 : i32, i32, i32
  }
  func.func @transform_4(%arg0: i32) -> (i32, i32, i32) {
    %c0_i32 = arith.constant 0 : i32
    %c0_i32_0 = arith.constant 0 : i32
    %c0_i32_1 = arith.constant 0 : i32
    return %arg0, %c0_i32, %c0_i32_0 : i32, i32, i32
  }
  func.func @transform_5(%arg0: i32) -> (i32, i32) {
    %c0_i32 = arith.constant 0 : i32
    %c0_i32_0 = arith.constant 0 : i32
    %c0_i32_1 = arith.constant 0 : i32
    return %c0_i32, %c0_i32_0 : i32, i32
  }
  func.func @transform_6(%arg0: i32) -> (i32, i32, i32) {
    %c0_i32 = arith.constant 0 : i32
    %c0_i32_0 = arith.constant 0 : i32
    %c0_i32_1 = arith.constant 0 : i32
    return %arg0, %c0_i32, %c0_i32_0 : i32, i32, i32
  }
}

</mosaic_0001>

<bundles_post_ra>
// kernel: tpu_custom_call.1
= control target key start
LH: loop header
LB: loop body
LE: loop exit
PB: predicated region body
PF: predicated region fallthrough
CT: control target
= control target key end

     0   :  { %11 = vsyncpa [#allocation5], 0  ;;  %s2237_s0 = inlined_call_operand.hbm [shape: f32[3], index: 0, kind: input, shape index: {}]   ;;  %s2238_s1 = inlined_call_operand.hbm [shape: f32[1,8,256], index: 1, kind: input, shape index: {}]   ;;  %s2239_s2 = inlined_call_operand.hbm [shape: f32[1,8,256], index: 2, kind: input, shape index: {}]   ;;  %s2240_s3 = inlined_call_operand.hbm [shape: f32[1,8,256], index: 3, kind: input, shape index: {}]   ;;  %s2241_s4 = inlined_call_operand.hbm [shape: f32[1,8,256], index: 4, kind: input, shape index: {}]   ;;  %s2242_s5 = inlined_call_operand.hbm [shape: f32[32,896], index: 5, kind: input, shape index: {}]   ;;  %s2243_s6 = inlined_call_operand.hbm [shape: f32[1,8,128], index: 6, kind: output, shape index: {}]  }
   0x1   :  { %12 = vsyncpa [#allocation3], 0 }
   0x2   :  { %13 = vsyncpa [#allocation8], 0 }
   0x3   :  { %14 = vsyncpa [#allocation11], 0 }
   0x4   :  { %15 = vsyncpa [#allocation4], 0  ;;  %s1779_s21 = smov [#allocation7]   ;;  %s1780_s23 = smov [#allocation10]  }
   0x5   :  { %s40_s22 = sshll.u32 %s1779_s21, 4  ;;  %s60_s24 = sshll.u32 %s1780_s23, 4  ;;  %s41_s22 = int_to_ptr.vmem [resolvable:$true] %s40_s22  ;;  %s61_s24 = int_to_ptr.vmem [resolvable:$true] %s60_s24 }
   0x6   :  { %s1627_s27 = scalar_lea.hbm %s2239_s2, 256 }
   0x7   :  { %p1628_p0 = scmp.ne.s32.totalorder %s2239_s2, %s1627_s27  ;;  %p1631_p1 = scmp.lt.u32.totalorder %s1627_s27, %s2239_s2 }
   0x9   :  { %p1633_p2 = pnand %p1631_p1, %p1628_p0 }
   0xb   :  { %1636 = shalt.err (!%p1633_p2)
}
   0xc   :  { %s1637_s8 = scalar_lea.vmem %s41_s22, 256  ;;  %p1642_p4 = scmp.lt.s32.totalorder %s41_s22, %s41_s22 }
   0xd   :  { %p1638_p3 = scmp.ne.s32.totalorder %s41_s22, %s1637_s8  ;;  %p1643_p5 = scmp.lt.s32.totalorder %s1637_s8, %s1637_s8 }
   0xf   :  { %p1644_p6 = por %p1643_p5, %p1642_p4 }
  0x11   :  { %p1645_p7 = pnand %p1644_p6, %p1638_p3 }
  0x13   :  { %1648 = shalt.err (!%p1645_p7)
}
  0x14   :  { %43 = dma.hbm_to_vmem [thread:$0]  %s2239_s2, 256, %s41_s22, [#allocation8]  }
  0x15   :  { %s1649_s13 = scalar_lea.hbm %s2241_s4, 256 }
  0x16   :  { %p1650_p8 = scmp.ne.s32.totalorder %s2241_s4, %s1649_s13  ;;  %p1653_p9 = scmp.lt.u32.totalorder %s1649_s13, %s2241_s4 }
  0x18   :  { %p1655_p10 = pnand %p1653_p9, %p1650_p8 }
  0x1a   :  { %1658 = shalt.err (!%p1655_p10)
}
  0x1b   :  { %s1659_s18 = scalar_lea.vmem %s61_s24, 256  ;;  %p1664_p12 = scmp.lt.s32.totalorder %s61_s24, %s61_s24 }
  0x1c   :  { %p1660_p11 = scmp.ne.s32.totalorder %s61_s24, %s1659_s18  ;;  %p1665_p13 = scmp.lt.s32.totalorder %s1659_s18, %s1659_s18 }
  0x1e   :  { %p1666_p0 = por %p1665_p13, %p1664_p12 }
  0x20   :  { %p1667_p1 = pnand %p1666_p0, %p1660_p11 }
  0x22   :  { %1670 = shalt.err (!%p1667_p1)
}
  0x23   :  { %63 = dma.hbm_to_vmem [thread:$0]  %s2241_s4, 256, %s61_s24, [#allocation11]  }
  0x24   :  { %s1671_s22 = scalar_lea.hbm %s2237_s0, 16 }
  0x25   :  { %p1672_p2 = scmp.ne.s32.totalorder %s2237_s0, %s1671_s22  ;;  %p1675_p3 = scmp.lt.u32.totalorder %s1671_s22, %s2237_s0 }
  0x27   :  { %p1677_p4 = pnand %p1675_p3, %p1672_p2 }
  0x29   :  { %1680 = shalt.err (!%p1677_p4)
}
  0x2a   :  { %s1781_s28 = smov [#allocation2]   ;;  %s1782_s4 = smov [#allocation6]  }
  0x2b   :  { %23 = dma.hbm_to_smem %s2237_s0, 16, %s1781_s28, [#allocation5]  }
  0x2c   :  { %s30_s24 = sshll.u32 %s1782_s4, 4  ;;  %s1783_s7 = smov [#allocation9]   ;;  %s31_s24 = int_to_ptr.vmem [resolvable:$true] %s30_s24 }
  0x2d   :  { %s50_s8 = sshll.u32 %s1783_s7, 4  ;;  %s1681_s11 = scalar_lea.hbm %s2238_s1, 256  ;;  %s51_s8 = int_to_ptr.vmem [resolvable:$true] %s50_s8 }
  0x2e   :  { %p1682_p5 = scmp.ne.s32.totalorder %s2238_s1, %s1681_s11  ;;  %p1685_p6 = scmp.lt.u32.totalorder %s1681_s11, %s2238_s1 }
  0x30   :  { %p1687_p7 = pnand %p1685_p6, %p1682_p5 }
  0x32   :  { %1690 = shalt.err (!%p1687_p7)
}
  0x33   :  { %s1691_s0 = scalar_lea.vmem %s31_s24, 256  ;;  %p1696_p9 = scmp.lt.s32.totalorder %s31_s24, %s31_s24 }
  0x34   :  { %p1692_p8 = scmp.ne.s32.totalorder %s31_s24, %s1691_s0  ;;  %p1697_p10 = scmp.lt.s32.totalorder %s1691_s0, %s1691_s0 }
  0x36   :  { %p1698_p11 = por %p1697_p10, %p1696_p9 }
  0x38   :  { %p1699_p12 = pnand %p1698_p11, %p1692_p8 }
  0x3a   :  { %1702 = shalt.err (!%p1699_p12)
}
  0x3b   :  { %33 = dma.hbm_to_vmem [thread:$0]  %s2238_s1, 256, %s31_s24, [#allocation3]  }
  0x3c   :  { %s1703_s19 = scalar_lea.hbm %s2240_s3, 256 }
  0x3d   :  { %p1704_p13 = scmp.ne.s32.totalorder %s2240_s3, %s1703_s19  ;;  %p1707_p0 = scmp.lt.u32.totalorder %s1703_s19, %s2240_s3 }
  0x3f   :  { %p1709_p1 = pnand %p1707_p0, %p1704_p13 }
  0x41   :  { %1712 = shalt.err (!%p1709_p1)
}
  0x42   :  { %s1713_s25 = scalar_lea.vmem %s51_s8, 256  ;;  %p1718_p3 = scmp.lt.s32.totalorder %s51_s8, %s51_s8 }
  0x43   :  { %p1714_p2 = scmp.ne.s32.totalorder %s51_s8, %s1713_s25  ;;  %p1719_p4 = scmp.lt.s32.totalorder %s1713_s25, %s1713_s25 }
  0x45   :  { %p1720_p5 = por %p1719_p4, %p1718_p3 }
  0x47   :  { %p1721_p6 = pnand %p1720_p5, %p1714_p2 }
  0x49   :  { %1724 = shalt.err (!%p1721_p6)
}
  0x4a   :  { %53 = dma.hbm_to_vmem [thread:$0]  %s2240_s3, 256, %s51_s8, [#allocation8]  }
  0x4b   :  { %s1784_s27 = smov [#allocation12]   ;;  %s1725_s4 = scalar_lea.hbm %s2242_s5, 3584 }
  0x4c   :  { %s69_s28 = sshll.u32 %s1784_s27, 4  ;;  %p1726_p7 = scmp.ne.s32.totalorder %s2242_s5, %s1725_s4  ;;  %s70_s28 = int_to_ptr.vmem [resolvable:$true] %s69_s28 }
  0x4d   :  { %p1729_p8 = scmp.lt.u32.totalorder %s1725_s4, %s2242_s5 }
  0x4f   :  { %p1731_p9 = pnand %p1729_p8, %p1726_p7 }
  0x51   :  { %1734 = shalt.err (!%p1731_p9)
}
  0x52   :  { %s1735_s11 = scalar_lea.vmem %s70_s28, 3584  ;;  %p1740_p11 = scmp.lt.s32.totalorder %s70_s28, %s70_s28 }
  0x53   :  { %p1736_p10 = scmp.ne.s32.totalorder %s70_s28, %s1735_s11  ;;  %p1741_p12 = scmp.lt.s32.totalorder %s1735_s11, %s1735_s11 }
  0x55   :  { %p1742_p13 = por %p1741_p12, %p1740_p11 }
  0x57   :  { %p1743_p0 = pnand %p1742_p13, %p1736_p10 }
  0x59   :  { %1746 = shalt.err (!%p1743_p0)
}
  0x5a   :  { %s1785_s3 = smov 896   ;;  %s1786_s8 = smov 56  }
  0x5b   :  { %75 = dma.hbm_to_vmem [thread:$0]  %s2242_s5, 3584, %s70_s28, [#allocation11], %s1785_s3, %s1785_s3, %s1786_s8  }
  0x5c   :  { %1769 = dma.done.wait [#allocation5], 16  }
  0x5d   :  { %1770 = vsyncadd [#allocation5], 4294967280 }
  0x5e   :  { %1771 = dma.done.wait [#allocation3], 256  }
  0x5f   :  { %1772 = vsyncadd [#allocation3], 4294967040 }
  0x60   :  { %1773 = dma.done.wait [#allocation8], 512  }
  0x61   :  { %1774 = vsyncadd [#allocation8], 4294966784 }
  0x62   :  { %1775 = dma.done.wait [#allocation11], 3840  }
  0x63   :  { %1776 = vsyncadd [#allocation11], 4294963456 }
  0x64   :  { %94 = sfence }
  0x65   :  { %v1912_v0 = vld [vmem:[#allocation9] sm:$0xff]  ;;  %v1914_v1 = vld [vmem:[#allocation9 + $0x8] sm:$0xff]  ;;  %v1918_v5 = vld [vmem:[#allocation10] sm:$0xff]  ;;  %s1787_s5 = smov 127   ;;  %v1788_v14 = vmov 0.0   ;;  %s1789_s14 = smov 120  }
  0x66   :  { %v119_v2 = vld [vmem:[#allocation6] sm:$0xff]  ;;  %v1422_v3 = vpack.i.bf16 %v1914_v1, %v1912_v0  ;;  %v120_v4 = vld [vmem:[#allocation6 + $0x8] sm:$0xff]  ;;  %v1920_v6 = vld [vmem:[#allocation10 + $0x8] sm:$0xff]  ;;  %252 = vmatprep.mubr.f32.mxu0 %v1788_v14  ;;  %389 = vmatprep.mubr.f32.mxu1 %v1788_v14  ;;  %s1790_s15 = smov 119   ;;  %v1791_v17 = vmov 0   ;;  %v1792_v18 = vmov 1  }
  0x67   :  { %v1412_v7 = vpack.i.bf16 %v120_v4, %v119_v2  ;;  %v1922_v8 = vld [vmem:[#allocation7] sm:$0xff]  ;;  %v1924_v9 = vld [vmem:[#allocation7 + $0x8] sm:$0xff]  ;;  %v1427_v10 = vpack.i.bf16 %v1920_v6, %v1918_v5  ;;  %v1956_v15 = vld [vmem:[#allocation12 + $0x68] sm:$0xff]  ;;  %1453 = vset.pattern.permute.xlu1 %v1791_v17  ;;  %1452 = vset.pattern.permute.xlu0 %v1791_v17  ;;  %v1793_v19 = vmov 2   ;;  %vm133_vm0 = vcmask 1039360   ;;  %s95_s0 = sld [smem:[#allocation2]] }
  0x68   :  { %1423 = vrot.lane.b32.xlu1 %v1422_v3, %s1787_s5  ;;  %v1253_v11 = vpack.c.bf16 %v1924_v9, %v120_v4  ;;  %v1255_v12 = vpack.c.bf16 %v1922_v8, %v119_v2  ;;  %v1417_v13 = vpack.i.bf16 %v1924_v9, %v1922_v8  ;;  %v1958_v16 = vld [vmem:[#allocation12 + $0x30] sm:$0xff]  ;;  %vm150_vm1 = vcmask 982016   ;;  %s1794_s16 = smov 126   ;;  %s1795_s17 = smov 118  }
  0x69   :  { %1413 = vrot.lane.b32.xlu0 %v1412_v7, %s1787_s5  ;;  %vm167_vm2 = vcmask 973824   ;;  %v1285_v61 = vpack.c.bf16 %v1920_v6, %v1914_v1  ;;  %vm181_vm3 = vcmask 588800   ;;  %s1796_s18 = smov 112   ;;  %s1797_s2 = smov 111  }
  0x6a   :  { %1254 = vmatprep.subr.bf16.mxu0 %v1253_v11  ;;  %s1798_s19 = smov 110   ;;  %s1219_s20 = sld [smem:[#allocation2 + $0x1]] }
  0x6b   :  { %1256 = vmatpush1.bf16.msra.mxu0 %v1255_v12  ;;  %v99_v12 = vld [vmem:[#allocation12 + $0x38] sm:$0xff]  ;;  %s1220_s21 = sld [smem:[#allocation2 + $0x2]]  ;;  %s1804_s22 = smov [#allocation13]  }
  0x6c   :  { %1428 = vrot.lane.b32.xlu1 %v1427_v10, %s1787_s5  ;;  %s1207_s23 = sshll.u32 %s1804_s22, 4  ;;  %s1208_s23 = int_to_ptr.vmem [resolvable:$true] %s1207_s23 }
  0x6d   :  { %1418 = vrot.lane.b32.xlu0 %v1417_v13, %s1787_s5  ;;  %s1747_s25 = scalar_lea.vmem %s1208_s23, 128  ;;  %p1752_p2 = scmp.lt.s32.totalorder %s1208_s23, %s1208_s23 }
  0x6e   :  { %p1748_p1 = scmp.ne.s32.totalorder %s1208_s23, %s1747_s25  ;;  %p1753_p3 = scmp.lt.s32.totalorder %s1747_s25, %s1747_s25 }
  0x70   :  { %1438 = vrot.lane.b32.xlu1 %v1417_v13, %s1789_s14  ;;  %p1754_p4 = por %p1753_p3, %p1752_p2 }
  0x71   :  { %1433 = vrot.lane.b32.xlu0 %v1412_v7, %s1789_s14 }
  0x72   :  { %p1755_p5 = pnand %p1754_p4, %p1748_p1 }
  0x74   :  { %165 = vrot.lane.b32.xlu1 %v120_v4, %s1790_s15 }
  0x75   :  { %163 = vrot.lane.b32.xlu0 %v119_v2, %s1790_s15  ;;  %v2002_v2 = vld [vmem:[#allocation12] sm:$0xff] }
  0x78   :  { %320 = vrot.lane.b32.xlu1 %v1924_v9, %s1790_s15 }
  0x79   :  { %318 = vrot.lane.b32.xlu0 %v1922_v8, %s1790_s15 }
  0x7c   :  { %1448 = vrot.lane.b32.xlu1 %v1427_v10, %s1789_s14 }
  0x7d   :  { %1443 = vrot.lane.b32.xlu0 %v1422_v3, %s1789_s14  ;;  %v1287_v3 = vpack.c.bf16 %v1918_v5, %v1912_v0 }
  0x80   :  { %442 = vrot.lane.b32.xlu1 %v1914_v1, %s1790_s15 }
  0x81   :  { %440 = vrot.lane.b32.xlu0 %v1912_v0, %s1790_s15 }
  0x84   :  { %546 = vrot.lane.b32.xlu1 %v1920_v6, %s1790_s15 }
  0x85   :  { %544 = vrot.lane.b32.xlu0 %v1918_v5, %s1790_s15 }
  0x88   :  { %178 = vperm.xlu1 %1453, %v1956_v15  }
  0x89   :  { %173 = vperm.xlu0 %1452, %v1958_v16  }
  0x8c   :  { %1454 = vset.pattern.permute.xlu1 %v1792_v18 }
  0x8d   :  { %1455 = vset.pattern.permute.xlu0 %v1792_v18  ;;  %279 = vperm.xlu1 %1454, %v1958_v16  }
  0x8e   :  { %283 = vperm.xlu0 %1455, %v1956_v15  }
  0x91   :  { %1456 = vset.pattern.permute.xlu1 %v1793_v19 }
  0x92   :  { %291 = vperm.xlu1 %1456, %v1958_v16  }
  0x96   :  { %295 = vperm.xlu1 %1456, %v1956_v15  }
  0xda   :  { %v1424_v20 = vpop.permute.xlu1 %1423 }
  0xdb   :  { %v1966_v21 = vunpack.i.h.bf16 %v1424_v20  ;;  %v1425_v22 = vunpack.i.l.bf16 %v1424_v20  ;;  %v1414_v23 = vpop.permute.xlu0 %1413 }
  0xdc   :  { %v1416_v24 = vunpack.i.h.bf16 %v1414_v23  ;;  %v1415_v25 = vunpack.i.l.bf16 %v1414_v23 }
  0xdd   :  { %v1973_v30 = vpack.c.bf16 %v1966_v21, %v1920_v6  ;;  %v1979_v34 = vsel %vm133_vm0, %v1425_v22, %v1966_v21 }
  0xde   :  { %v1429_v26 = vpop.permute.xlu1 %1428  ;;  %v1257_v27 = vpack.c.bf16 %v1914_v1, %v1416_v24  ;;  %v1269_v28 = vpack.c.bf16 %v1416_v24, %v1924_v9  ;;  %v134_v29 = vsel %vm133_vm0, %v1415_v25, %v1416_v24  ;;  %v1263_v45 = vpack.c.bf16 %v1979_v34, %v1918_v5 }
  0xdf   :  { %v1419_v31 = vpop.permute.xlu0 %1418  ;;  %v1259_v32 = vpack.c.bf16 %v1912_v0, %v134_v29  ;;  %v1271_v33 = vpack.c.bf16 %v134_v29, %v1922_v8  ;;  %v1981_v35 = vunpack.i.h.bf16 %v1429_v26  ;;  %v1430_v36 = vunpack.i.l.bf16 %v1429_v26 }
  0xe0   :  { %v1421_v37 = vunpack.i.h.bf16 %v1419_v31  ;;  %v1420_v38 = vunpack.i.l.bf16 %v1419_v31  ;;  %1258 = vmatprep.subr.bf16.mxu0 %v1257_v27  ;;  %1270 = vmatprep.subr.bf16.mxu1 %v1269_v28 }
  0xe1   :  { %1260 = vmatpush1.bf16.msra.mxu0 %v1259_v32  ;;  %1272 = vmatpush1.bf16.msra.mxu1 %v1271_v33  ;;  %v1277_v49 = vpack.c.bf16 %v1981_v35, %v1966_v21  ;;  %v1993_v50 = vsel %vm133_vm0, %v1430_v36, %v1981_v35 }
  0xe2   :  { %v1273_v39 = vpack.c.bf16 %v1920_v6, %v1421_v37  ;;  %1262 = vmatprep.subr.bf16.mxu0 %v1973_v30  ;;  %v1439_v40 = vpop.permute.xlu1 %1438  ;;  %v306_v41 = vsel %vm133_vm0, %v1420_v38, %v1421_v37  ;;  %v1279_v57 = vpack.c.bf16 %v1993_v50, %v1979_v34 }
  0xe3   :  { %v1441_v42 = vunpack.i.h.bf16 %v1439_v40  ;;  %v1440_v43 = vunpack.i.l.bf16 %v1439_v40  ;;  %v1434_v44 = vpop.permute.xlu0 %1433  ;;  %v1275_v46 = vpack.c.bf16 %v1918_v5, %v306_v41 }
  0xe4   :  { %v1436_v47 = vunpack.i.h.bf16 %v1434_v44  ;;  %v1435_v48 = vunpack.i.l.bf16 %v1434_v44  ;;  %1274 = vmatprep.subr.bf16.mxu1 %v1273_v39 }
  0xe5   :  { %1264 = vmatpush1.bf16.msra.mxu0 %v1263_v45  ;;  %1276 = vmatpush1.bf16.msra.mxu1 %v1275_v46  ;;  %v160_v51 = vsel %vm150_vm1, %v1440_v43, %v1441_v42  ;;  %v1305_v5 = vpack.c.bf16 %v1441_v42, %v1981_v35 }
  0xe6   :  { %1278 = vmatprep.subr.bf16.mxu1 %v1277_v49  ;;  %v166_v52 = vpop.permute.xlu1 %165  ;;  %v1265_v53 = vpack.c.bf16 %v1441_v42, %v1436_v47  ;;  %v151_v54 = vsel %vm150_vm1, %v1435_v48, %v1436_v47  ;;  %v1289_v4 = vpack.c.bf16 %v1436_v47, %v1966_v21  ;;  %v1307_v19 = vpack.c.bf16 %v160_v51, %v1993_v50 }
  0xe7   :  { %v164_v55 = vpop.permute.xlu0 %163  ;;  %v1267_v56 = vpack.c.bf16 %v160_v51, %v151_v54  ;;  %v1281_v58 = vpack.c.bf16 %v166_v52, %v1441_v42  ;;  %v1291_v0 = vpack.c.bf16 %v151_v54, %v1979_v34  ;;  %v2038_v34 = vstv %s95_s0 }
  0xe8   :  { %1266 = vmatprep.subr.bf16.mxu0 %v1265_v53  ;;  %v168_v59 = vsel %vm167_vm2, %v164_v55, %v166_v52 }
  0xe9   :  { %1268 = vmatpush1.bf16.msra.mxu0 %v1267_v56  ;;  %1280 = vmatpush1.bf16.msra.mxu1 %v1279_v57  ;;  %v1283_v63 = vpack.c.bf16 %v168_v59, %v160_v51 }
  0xea   :  { %204 = vmatprep.subr.mxu0 %v166_v52  ;;  %1282 = vmatprep.subr.bf16.mxu1 %v1281_v58  ;;  %v321_v60 = vpop.permute.xlu1 %320 }
  0xeb   :  { %v319_v62 = vpop.permute.xlu0 %318  ;;  %v1309_v21 = vpack.c.bf16 %v321_v60, %v166_v52 }
  0xec   :  { %v322_v1 = vsel %vm167_vm2, %v319_v62, %v321_v60 }
  0xed   :  { %205 = vmatpush1.msra.mxu0 %v168_v59  ;;  %1284 = vmatpush1.bf16.msra.mxu1 %v1283_v63  ;;  %v1311_v25 = vpack.c.bf16 %v322_v1, %v168_v59 }
  0xee   :  { %1286 = vmatprep.subr.bf16.mxu0 %v1285_v61  ;;  %1221 = vmatmul.mubr.msk.f32.vlgmr.msra.gmra.mrb[0].mxu0 %vm181_vm3, %v2002_v2  ;;  %v1449_v7 = vpop.permute.xlu1 %1448 }
  0xef   :  { %1288 = vmatpush1.bf16.msra.mxu0 %v1287_v3  ;;  %341 = vmatprep.subr.mxu1 %v321_v60  ;;  %v1444_v6 = vpop.permute.xlu0 %1443  ;;  %v1451_v8 = vunpack.i.h.bf16 %v1449_v7  ;;  %v1450_v9 = vunpack.i.l.bf16 %v1449_v7 }
  0xf0   :  { %1290 = vmatprep.subr.bf16.mxu0 %v1289_v4  ;;  %v1446_v10 = vunpack.i.h.bf16 %v1444_v6  ;;  %v1445_v11 = vunpack.i.l.bf16 %v1444_v6  ;;  %258 = vmatprep.mubr.f32.mxu0 %v1788_v14 }
  0xf1   :  { %342 = vmatpush1.msra.mxu1 %v322_v1  ;;  %v437_v17 = vsel %vm150_vm1, %v1450_v9, %v1451_v8 }
  0xf2   :  { %1223 = vmatmul.mubr.msk.f32.vlgmr.msra.gmra.mrb[0].mxu1 %vm181_vm3, %v2002_v2  ;;  %1302 = vmatprep.subr.bf16.mxu1 %v1973_v30  ;;  %v1297_v13 = vpack.c.bf16 %v1451_v8, %v1446_v10  ;;  %v430_v18 = vsel %vm150_vm1, %v1445_v11, %v1446_v10  ;;  %v443_v20 = vpop.permute.xlu1 %442 }
  0xf3   :  { %1292 = vmatpush1.bf16.msra.mxu0 %v1291_v0  ;;  %1304 = vmatpush1.bf16.msra.mxu1 %v1263_v45  ;;  %v441_v22 = vpop.permute.xlu0 %440  ;;  %v1299_v23 = vpack.c.bf16 %v437_v17, %v430_v18  ;;  %v1313_v24 = vpack.c.bf16 %v443_v20, %v1451_v8 }
  0xf4   :  { %1294 = vmatprep.subr.bf16.mxu0 %v1281_v58  ;;  %1306 = vmatprep.subr.bf16.mxu1 %v1305_v5  ;;  %v444_v26 = vsel %vm167_vm2, %v441_v22, %v443_v20 }
  0xf5   :  { %1222 = vmatmul.mubr.msk.f32.gmra.mrb[2].mxu0 %vm181_vm3, %v99_v12  ;;  %395 = vmatprep.mubr.f32.mxu1 %v1788_v14  ;;  %v1315_v27 = vpack.c.bf16 %v444_v26, %v437_v17 }
  0xf6   :  { %1224 = vmatmul.mubr.msk.f32.gmra.mrb[2].mxu1 %vm181_vm3, %v99_v12  ;;  %511 = vmatprep.mubr.f32.mxu0 %v1788_v14  ;;  %v547_v28 = vpop.permute.xlu1 %546 }
  0xf7   :  { %1296 = vmatpush1.bf16.msra.mxu0 %v1283_v63  ;;  %1308 = vmatpush1.bf16.msra.mxu1 %v1307_v19  ;;  %v545_v29 = vpop.permute.xlu0 %544 }
  0xf8   :  { %1310 = vmatprep.subr.bf16.mxu1 %v1309_v21  ;;  %1298 = vmatprep.subr.bf16.mxu0 %v1297_v13  ;;  %v548_v30 = vsel %vm167_vm2, %v545_v29, %v547_v28 }
  0xf9   :  { %615 = vmatprep.mubr.f32.mxu1 %v1788_v14 }
  0xfb   :  { %1300 = vmatpush1.bf16.msra.mxu0 %v1299_v23  ;;  %1312 = vmatpush1.bf16.msra.mxu1 %v1311_v25 }
  0xfc   :  { %463 = vmatprep.subr.mxu0 %v443_v20  ;;  %1314 = vmatprep.subr.bf16.mxu1 %v1313_v24 }
  0xff   :  { %464 = vmatpush1.msra.mxu0 %v444_v26  ;;  %1316 = vmatpush1.bf16.msra.mxu1 %v1315_v27 }
 0x100   :  { %1225 = vmatmul.mubr.msk.f32.vlgmr.msra.gmra.mrb[4].mxu0 %vm181_vm3, %v2002_v2  ;;  %567 = vmatprep.subr.mxu1 %v547_v28 }
 0x101   :  { %517 = vmatprep.mubr.f32.mxu0 %v1788_v14 }
 0x103   :  { %568 = vmatpush1.msra.mxu1 %v548_v30 }
 0x104   :  { %1226 = vmatmul.mubr.msk.f32.gmra.mrb[6].mxu0 %vm181_vm3, %v99_v12  ;;  %1227 = vmatmul.mubr.msk.f32.vlgmr.msra.gmra.mrb[4].mxu1 %vm181_vm3, %v2002_v2 }
 0x105   :  { %621 = vmatprep.mubr.f32.mxu1 %v1788_v14 }
 0x107   :  { %v2034_v31 = vpop.permute.xlu1 %178 }
 0x108   :  { %1228 = vmatmul.mubr.msk.f32.gmra.mrb[6].mxu1 %vm181_vm3, %v99_v12  ;;  %v2036_v32 = vpop.permute.xlu0 %173 }
 0x10c   :  { %v2040_v35 = vpop.permute.xlu1 %279 }
 0x10d   :  { %v2062_v2 = vpop.permute.xlu0 %283 }
 0x111   :  { %v2048_v47 = vpop.permute.xlu1 %291 }
 0x115   :  { %v2068_v8 = vpop.permute.xlu1 %295 }
 0x1c1   :  { %v254_v33 = vpop.f32.mrb[0].mxu0 }
 0x1c2   :  { %v255_v36 = vadd.f32 %v254_v33, %v2036_v32  ;;  %v256_v37 = vpop.f32.mrb[1].mxu0 }
 0x1c3   :  { %v257_v38 = vadd.f32 %v256_v37, %v2036_v32 }
 0x1c4   :  { %vm265_vm4 = vcmp.ge.f32.partialorder %v255_v36, 0.0  ;;  %v270_v39 = vmul.f32 %v2038_v34, %v255_v36 }
 0x1c5   :  { %vm266_vm5 = vcmp.ge.f32.partialorder %v257_v38, 0.0  ;;  %v271_v40 = vmul.f32 %v2038_v34, %v257_v38  ;;  %v391_v41 = vpop.f32.mrb[0].mxu1 }
 0x1c6   :  { %v392_v42 = vadd.f32 %v391_v41, %v2036_v32  ;;  %v393_v43 = vpop.f32.mrb[1].mxu1  ;;  %v274_v44 = vsel %vm265_vm4, %v255_v36, %v270_v39 }
 0x1c7   :  { %v275_v45 = vsel %vm266_vm5, %v257_v38, %v271_v40  ;;  %v394_v46 = vadd.f32 %v393_v43, %v2036_v32  ;;  %v286_v48 = vmul.f32 %v2040_v35, %v274_v44 }
 0x1c8   :  { %vm402_vm6 = vcmp.ge.f32.partialorder %v392_v42, 0.0  ;;  %v406_v49 = vmul.f32 %v392_v42, %v2038_v34  ;;  %v260_v50 = vpop.f32.mrb[2].mxu0  ;;  %v287_v55 = vmul.f32 %v2040_v35, %v275_v45 }
 0x1c9   :  { %vm403_vm7 = vcmp.ge.f32.partialorder %v394_v46, 0.0  ;;  %v407_v51 = vmul.f32 %v394_v46, %v2038_v34  ;;  %v261_v52 = vadd.f32 %v260_v50, %v2034_v31  ;;  %v397_v53 = vpop.f32.mrb[2].mxu1  ;;  %v262_v54 = vpop.f32.mrb[3].mxu0  ;;  %v2058_v60 = vadd.f32 %v2048_v47, %v286_v48 }
 0x1ca   :  { %v410_v56 = vsel %vm402_vm6, %v392_v42, %v406_v49  ;;  %v398_v57 = vadd.f32 %v397_v53, %v2034_v31  ;;  %v263_v58 = vadd.f32 %v262_v54, %v2034_v31  ;;  %v399_v59 = vpop.f32.mrb[3].mxu1  ;;  %v2078_v18 = vadd.f32 %v2048_v47, %v287_v55 }
 0x1cb   :  { %v411_v61 = vsel %vm403_vm7, %v394_v46, %v407_v51  ;;  %vm267_vm8 = vcmp.ge.f32.partialorder %v261_v52, 0.0  ;;  %v272_v62 = vmul.f32 %v2038_v34, %v261_v52  ;;  %v400_v63 = vadd.f32 %v399_v59, %v2034_v31 }
 0x1cc   :  { %vm404_vm9 = vcmp.ge.f32.partialorder %v398_v57, 0.0  ;;  %v408_v3 = vmul.f32 %v398_v57, %v2038_v34  ;;  %vm268_vm10 = vcmp.ge.f32.partialorder %v263_v58, 0.0  ;;  %v273_v4 = vmul.f32 %v2038_v34, %v263_v58 }
 0x1cd   :  { %v276_v7 = vsel %vm267_vm8, %v261_v52, %v272_v62  ;;  %vm405_vm11 = vcmp.ge.f32.partialorder %v400_v63, 0.0  ;;  %v409_v1 = vmul.f32 %v400_v63, %v2038_v34  ;;  %v414_v6 = vmul.f32 %v410_v56, %v2040_v35 }
 0x1ce   :  { %v412_v9 = vsel %vm404_vm9, %v398_v57, %v408_v3  ;;  %v277_v10 = vsel %vm268_vm10, %v263_v58, %v273_v4  ;;  %v415_v11 = vmul.f32 %v411_v61, %v2040_v35  ;;  %v288_v0 = vmul.f32 %v2062_v2, %v276_v7 }
 0x1cf   :  { %v413_v5 = vsel %vm405_vm11, %v400_v63, %v409_v1  ;;  %v2073_v12 = vadd.f32 %v414_v6, %v2048_v47  ;;  %v416_v13 = vmul.f32 %v412_v9, %v2062_v2  ;;  %v289_v17 = vmul.f32 %v2062_v2, %v277_v10 }
 0x1d0   :  { %v2081_v19 = vadd.f32 %v415_v11, %v2048_v47  ;;  %v2084_v20 = vadd.f32 %v2068_v8, %v288_v0  ;;  %v417_v21 = vmul.f32 %v413_v5, %v2062_v2  ;;  %vm785_vm7 = vcmask 130048  }
 0x1d1   :  { %v422_v22 = vmax.f32 %v2058_v60, %v2073_v12  ;;  %v2090_v23 = vadd.f32 %v416_v13, %v2068_v8  ;;  %v2093_v24 = vadd.f32 %v2068_v8, %v289_v17  ;;  %vm682_vm8 = vcmask 1031168  }
 0x1d2   :  { %v423_v25 = vmax.f32 %v2078_v18, %v2081_v19  ;;  %v2098_v26 = vadd.f32 %v417_v21, %v2068_v8  ;;  %vm725_vm9 = vcmask 965632   ;;  %vm740_vm10 = vcmask 916480  }
 0x1d3   :  { %v513_v27 = vpop.f32.mrb[4].mxu0  ;;  %v424_v28 = vmax.f32 %v2084_v20, %v2090_v23  ;;  %v1799_v20 = vmov 3   ;;  %vm755_vm11 = vcmask 908288  }
 0x1d4   :  { %v514_v29 = vadd.f32 %v513_v27, %v2036_v32  ;;  %v515_v30 = vpop.f32.mrb[5].mxu0  ;;  %v425_v33 = vmax.f32 %v2093_v24, %v2098_v26  ;;  %1537 = vset.pattern.permute.xlu0 %v1799_v20  ;;  %1538 = vset.pattern.permute.xlu1 %v1799_v20 }
 0x1d5   :  { %v516_v36 = vadd.f32 %v515_v30, %v2036_v32 }
 0x1d6   :  { %vm524_vm12 = vcmp.ge.f32.partialorder %v514_v29, 0.0  ;;  %v528_v37 = vmul.f32 %v514_v29, %v2038_v34 }
 0x1d7   :  { %vm525_vm13 = vcmp.ge.f32.partialorder %v516_v36, 0.0  ;;  %v529_v38 = vmul.f32 %v516_v36, %v2038_v34  ;;  %v519_v39 = vpop.f32.mrb[6].mxu0  ;;  %v617_v40 = vpop.f32.mrb[4].mxu1 }
 0x1d8   :  { %v532_v41 = vsel %vm524_vm12, %v514_v29, %v528_v37  ;;  %v520_v42 = vadd.f32 %v519_v39, %v2034_v31  ;;  %v618_v43 = vadd.f32 %v617_v40, %v2036_v32  ;;  %v521_v44 = vpop.f32.mrb[7].mxu0  ;;  %v619_v45 = vpop.f32.mrb[5].mxu1  ;;  %vm770_vm12 = vcmask 900096  }
 0x1d9   :  { %v522_v46 = vadd.f32 %v521_v44, %v2034_v31  ;;  %v620_v48 = vadd.f32 %v619_v45, %v2036_v32  ;;  %v533_v49 = vsel %vm525_vm13, %v516_v36, %v529_v38  ;;  %v536_v51 = vmul.f32 %v532_v41, %v2040_v35 }
 0x1da   :  { %vm526_vm14 = vcmp.ge.f32.partialorder %v520_v42, 0.0  ;;  %v530_v50 = vmul.f32 %v520_v42, %v2038_v34  ;;  %vm628_vm15 = vcmp.ge.f32.partialorder %v618_v43, 0.0  ;;  %v632_v52 = vmul.f32 %v618_v43, %v2038_v34 }
 0x1db   :  { %vm527_vm3 = vcmp.ge.f32.partialorder %v522_v46, 0.0  ;;  %v531_v53 = vmul.f32 %v522_v46, %v2038_v34  ;;  %v623_v54 = vpop.f32.mrb[6].mxu1  ;;  %vm629_vm4 = vcmp.ge.f32.partialorder %v620_v48, 0.0  ;;  %v633_v55 = vmul.f32 %v620_v48, %v2038_v34 }
 0x1dc   :  { %v625_v56 = vpop.f32.mrb[7].mxu1  ;;  %v537_v57 = vmul.f32 %v533_v49, %v2040_v35  ;;  %v534_v32 = vsel %vm526_vm14, %v520_v42, %v530_v50  ;;  %v636_v58 = vsel %vm628_vm15, %v618_v43, %v632_v52  ;;  %v624_v59 = vadd.f32 %v623_v54, %v2034_v31 }
 0x1dd   :  { %v640_v60 = vmul.f32 %v636_v58, %v2040_v35  ;;  %v535_v61 = vsel %vm527_vm3, %v522_v46, %v531_v53  ;;  %v637_v62 = vsel %vm629_vm4, %v620_v48, %v633_v55  ;;  %v626_v63 = vadd.f32 %v625_v56, %v2034_v31 }
 0x1de   :  { %v540_v3 = vadd.f32 %v536_v51, %v2048_v47  ;;  %v641_v4 = vmul.f32 %v637_v62, %v2040_v35  ;;  %vm630_vm5 = vcmp.ge.f32.partialorder %v624_v59, 0.0  ;;  %v634_v7 = vmul.f32 %v624_v59, %v2038_v34 }
 0x1df   :  { %v538_v1 = vmul.f32 %v534_v32, %v2062_v2  ;;  %v644_v6 = vadd.f32 %v640_v60, %v2048_v47  ;;  %vm631_vm6 = vcmp.ge.f32.partialorder %v626_v63, 0.0  ;;  %v635_v9 = vmul.f32 %v626_v63, %v2038_v34 }
 0x1e0   :  { %v541_v10 = vadd.f32 %v537_v57, %v2048_v47  ;;  %v539_v11 = vmul.f32 %v535_v61, %v2062_v2  ;;  %v645_v31 = vadd.f32 %v641_v4, %v2048_v47  ;;  %v638_v0 = vsel %vm630_vm5, %v624_v59, %v634_v7 }
 0x1e1   :  { %v648_v5 = vmax.f32 %v540_v3, %v644_v6  ;;  %v642_v35 = vmul.f32 %v638_v0, %v2062_v2  ;;  %v639_v12 = vsel %vm631_vm6, %v626_v63, %v635_v9  ;;  %v542_v19 = vadd.f32 %v538_v1, %v2068_v8 }
 0x1e2   :  { %v649_v13 = vmax.f32 %v541_v10, %v645_v31  ;;  %v643_v17 = vmul.f32 %v639_v12, %v2062_v2  ;;  %v543_v34 = vadd.f32 %v539_v11, %v2068_v8  ;;  %vm1116_vm6 = vcmask 261120  }
 0x1e3   :  { %v652_v18 = vmax.f32 %v422_v22, %v648_v5  ;;  %v646_v21 = vadd.f32 %v642_v35, %v2068_v8 }
 0x1e4   :  { %v653_v24 = vmax.f32 %v423_v25, %v649_v13  ;;  %v647_v26 = vadd.f32 %v643_v17, %v2068_v8  ;;  %v101_v8 = vld [vmem:[#allocation12 + $0x10] sm:$0xff] }
 0x1e5   :  { %v650_v27 = vmax.f32 %v542_v19, %v646_v21  ;;  %1229 = vmatprep.mubr.msk.f32.mxu0 %vm785_vm7, %v101_v8 }
 0x1e6   :  { %v651_v47 = vmax.f32 %v543_v34, %v647_v26  ;;  %v1457_v29 = vpack.i.bf16 %v653_v24, %v652_v18 }
 0x1e7   :  { %v654_v30 = vmax.f32 %v424_v28, %v650_v27 }
 0x1e8   :  { %v655_v36 = vmax.f32 %v425_v33, %v651_v47  ;;  %1458 = vrot.lane.b32.xlu0 %v1457_v29, %s1787_s5 }
 0x1e9   :  { %v1319_v2 = vpack.c.bf16 %v654_v30, %v652_v18 }
 0x1ea   :  { %v1497_v22 = vpack.i.bf16 %v655_v36, %v654_v30  ;;  %v1317_v37 = vpack.c.bf16 %v655_v36, %v653_v24 }
 0x1ec   :  { %1498 = vrot.lane.b32.xlu1 %v1497_v22, %s1787_s5  ;;  %1318 = vmatprep.subr.bf16.mxu0 %v1317_v37 }
 0x1ed   :  { %1463 = vrot.lane.b32.xlu0 %v1457_v29, %s1794_s16  ;;  %1320 = vmatpush1.bf16.msra.mxu0 %v1319_v2 }
 0x1f0   :  { %1503 = vrot.lane.b32.xlu1 %v1497_v22, %s1794_s16 }
 0x1f1   :  { %1468 = vrot.lane.b32.xlu0 %v1457_v29, %s1789_s14 }
 0x1f4   :  { %1508 = vrot.lane.b32.xlu1 %v1497_v22, %s1789_s14 }
 0x1f5   :  { %1473 = vrot.lane.b32.xlu0 %v1457_v29, %s1790_s15 }
 0x1f8   :  { %1513 = vrot.lane.b32.xlu1 %v1497_v22, %s1790_s15 }
 0x1f9   :  { %1478 = vrot.lane.b32.xlu0 %v1457_v29, %s1795_s17 }
 0x1fc   :  { %1518 = vrot.lane.b32.xlu1 %v1497_v22, %s1795_s17 }
 0x1fd   :  { %1483 = vrot.lane.b32.xlu0 %v1457_v29, %s1796_s18 }
 0x200   :  { %1523 = vrot.lane.b32.xlu1 %v1497_v22, %s1796_s18 }
 0x201   :  { %1488 = vrot.lane.b32.xlu0 %v1457_v29, %s1797_s2 }
 0x204   :  { %1528 = vrot.lane.b32.xlu1 %v1497_v22, %s1797_s2 }
 0x205   :  { %1493 = vrot.lane.b32.xlu0 %v1457_v29, %s1798_s19 }
 0x208   :  { %1533 = vrot.lane.b32.xlu1 %v1497_v22, %s1798_s19 }
 0x209   :  { %778 = vperm.xlu0 %1537, %v1958_v16  }
 0x20c   :  { %782 = vperm.xlu1 %1538, %v1956_v15  }
 0x25a   :  { %v1459_v23 = vpop.permute.xlu0 %1458 }
 0x25b   :  { %v1461_v25 = vunpack.i.h.bf16 %v1459_v23  ;;  %v1460_v28 = vunpack.i.l.bf16 %v1459_v23 }
 0x25d   :  { %v668_v41 = vsel %vm133_vm0, %v1460_v28, %v1461_v25 }
 0x25e   :  { %v1499_v33 = vpop.permute.xlu1 %1498 }
 0x25f   :  { %v1501_v38 = vunpack.i.h.bf16 %v1499_v33  ;;  %v1500_v39 = vunpack.i.l.bf16 %v1499_v33  ;;  %v1464_v40 = vpop.permute.xlu0 %1463 }
 0x260   :  { %v1466_v44 = vunpack.i.h.bf16 %v1464_v40  ;;  %v1465_v45 = vunpack.i.l.bf16 %v1464_v40 }
 0x261   :  { %v669_v42 = vsel %vm133_vm0, %v1500_v39, %v1501_v38  ;;  %v1321_v43 = vpack.c.bf16 %v1501_v38, %v1461_v25 }
 0x262   :  { %v1323_v46 = vpack.c.bf16 %v669_v42, %v668_v41  ;;  %v1504_v48 = vpop.permute.xlu1 %1503  ;;  %v683_v54 = vsel %vm682_vm8, %v1465_v45, %v1466_v44 }
 0x263   :  { %v1506_v49 = vunpack.i.h.bf16 %v1504_v48  ;;  %v1505_v50 = vunpack.i.l.bf16 %v1504_v48  ;;  %v1469_v51 = vpop.permute.xlu0 %1468  ;;  %1322 = vmatprep.subr.bf16.mxu0 %v1321_v43 }
 0x264   :  { %v1471_v52 = vunpack.i.h.bf16 %v1469_v51  ;;  %v1470_v53 = vunpack.i.l.bf16 %v1469_v51  ;;  %1324 = vmatpush1.bf16.msra.mxu0 %v1323_v46 }
 0x265   :  { %v684_v55 = vsel %vm682_vm8, %v1505_v50, %v1506_v49  ;;  %v1325_v56 = vpack.c.bf16 %v1506_v49, %v1466_v44 }
 0x266   :  { %v1327_v57 = vpack.c.bf16 %v684_v55, %v683_v54  ;;  %v1509_v32 = vpop.permute.xlu1 %1508  ;;  %v697_v61 = vsel %vm150_vm1, %v1470_v53, %v1471_v52  ;;  %v100_v54 = vld [vmem:[#allocation12 + $0x8] sm:$0xff] }
 0x267   :  { %v1511_v58 = vunpack.i.h.bf16 %v1509_v32  ;;  %v1510_v59 = vunpack.i.l.bf16 %v1509_v32  ;;  %v1474_v60 = vpop.permute.xlu0 %1473  ;;  %1326 = vmatprep.subr.bf16.mxu0 %v1325_v56  ;;  %v103_v55 = vld [vmem:[#allocation12 + $0x48] sm:$0xff]  ;;  %v102_v56 = vld [vmem:[#allocation12 + $0x40] sm:$0xff] }
 0x268   :  { %1328 = vmatpush1.bf16.msra.mxu0 %v1327_v57  ;;  %v1476_v3 = vunpack.i.h.bf16 %v1474_v60  ;;  %v1475_v4 = vunpack.i.l.bf16 %v1474_v60  ;;  %v1800_v57 = vmov 0.0|0.0  }
 0x269   :  { %v698_v62 = vsel %vm150_vm1, %v1510_v59, %v1511_v58  ;;  %v1329_v63 = vpack.c.bf16 %v1511_v58, %v1471_v52  ;;  %1353 = vmatprep.subr.bf16.mxu1 %v1800_v57  ;;  %v873_v59 = vstv %s1219_s20 }
 0x26a   :  { %v1331_v7 = vpack.c.bf16 %v698_v62, %v697_v61  ;;  %v1514_v1 = vpop.permute.xlu1 %1513  ;;  %v711_v0 = vsel %vm167_vm2, %v1475_v4, %v1476_v3 }
 0x26b   :  { %v1516_v6 = vunpack.i.h.bf16 %v1514_v1  ;;  %v1515_v9 = vunpack.i.l.bf16 %v1514_v1  ;;  %v1479_v10 = vpop.permute.xlu0 %1478  ;;  %1330 = vmatprep.subr.bf16.mxu0 %v1329_v63 }
 0x26c   :  { %v1481_v11 = vunpack.i.h.bf16 %v1479_v10  ;;  %v1480_v31 = vunpack.i.l.bf16 %v1479_v10  ;;  %1332 = vmatpush1.bf16.msra.mxu0 %v1331_v7 }
 0x26d   :  { %v712_v5 = vsel %vm167_vm2, %v1515_v9, %v1516_v6  ;;  %v1333_v35 = vpack.c.bf16 %v1516_v6, %v1476_v3 }
 0x26e   :  { %v1335_v12 = vpack.c.bf16 %v712_v5, %v711_v0  ;;  %v1519_v13 = vpop.permute.xlu1 %1518  ;;  %v726_v21 = vsel %vm725_vm9, %v1480_v31, %v1481_v11 }
 0x26f   :  { %v1521_v17 = vunpack.i.h.bf16 %v1519_v13  ;;  %v1520_v18 = vunpack.i.l.bf16 %v1519_v13  ;;  %v1484_v19 = vpop.permute.xlu0 %1483  ;;  %1334 = vmatprep.subr.bf16.mxu0 %v1333_v35 }
 0x270   :  { %1336 = vmatpush1.bf16.msra.mxu0 %v1335_v12  ;;  %v1486_v26 = vunpack.i.h.bf16 %v1484_v19  ;;  %v1485_v27 = vunpack.i.l.bf16 %v1484_v19  ;;  %v1801_v19 = vmov 4  }
 0x271   :  { %v727_v34 = vsel %vm725_vm9, %v1520_v18, %v1521_v17  ;;  %v1337_v24 = vpack.c.bf16 %v1521_v17, %v1481_v11  ;;  %v105_v18 = vld [vmem:[#allocation12 + $0x20] sm:$0xff]  ;;  %1619 = vset.pattern.permute.xlu1 %v1801_v19  ;;  %1620 = vset.pattern.permute.xlu0 %v1801_v19 }
 0x272   :  { %v1339_v47 = vpack.c.bf16 %v727_v34, %v726_v21  ;;  %v1524_v29 = vpop.permute.xlu1 %1523  ;;  %v741_v8 = vsel %vm740_vm10, %v1485_v27, %v1486_v26  ;;  %1231 = vmatprep.mubr.msk.f32.mxu1 %vm785_vm7, %v105_v18  ;;  %v117_v21 = vld [vmem:[#allocation12 + $0xa0] sm:$0xff]  ;;  %v118_v34 = vld [vmem:[#allocation12 + $0xd8] sm:$0xff] }
 0x273   :  { %v1526_v30 = vunpack.i.h.bf16 %v1524_v29  ;;  %v1525_v36 = vunpack.i.l.bf16 %v1524_v29  ;;  %v1489_v2 = vpop.permute.xlu0 %1488  ;;  %1338 = vmatprep.subr.bf16.mxu0 %v1337_v24 }
 0x274   :  { %v1491_v22 = vunpack.i.h.bf16 %v1489_v2  ;;  %v1490_v37 = vunpack.i.l.bf16 %v1489_v2  ;;  %1340 = vmatpush1.bf16.msra.mxu0 %v1339_v47 }
 0x275   :  { %v742_v20 = vsel %vm740_vm10, %v1525_v36, %v1526_v30  ;;  %v1341_v23 = vpack.c.bf16 %v1526_v30, %v1486_v26 }
 0x276   :  { %v1343_v25 = vpack.c.bf16 %v742_v20, %v741_v8  ;;  %v1529_v28 = vpop.permute.xlu1 %1528  ;;  %v756_v40 = vsel %vm755_vm11, %v1490_v37, %v1491_v22 }
 0x277   :  { %v1531_v33 = vunpack.i.h.bf16 %v1529_v28  ;;  %v1530_v38 = vunpack.i.l.bf16 %v1529_v28  ;;  %v1494_v39 = vpop.permute.xlu0 %1493  ;;  %1342 = vmatprep.subr.bf16.mxu0 %v1341_v23 }
 0x278   :  { %1344 = vmatpush1.bf16.msra.mxu0 %v1343_v25  ;;  %v1496_v43 = vunpack.i.h.bf16 %v1494_v39  ;;  %v1495_v44 = vunpack.i.l.bf16 %v1494_v39 }
 0x279   :  { %v757_v41 = vsel %vm755_vm11, %v1530_v38, %v1531_v33  ;;  %v1345_v42 = vpack.c.bf16 %v1531_v33, %v1491_v22 }
 0x27a   :  { %v1347_v45 = vpack.c.bf16 %v757_v41, %v756_v40  ;;  %v1534_v46 = vpop.permute.xlu1 %1533  ;;  %v771_v50 = vsel %vm770_vm12, %v1495_v44, %v1496_v43 }
 0x27b   :  { %v1536_v48 = vunpack.i.h.bf16 %v1534_v46  ;;  %v1535_v49 = vunpack.i.l.bf16 %v1534_v46  ;;  %1346 = vmatprep.subr.bf16.mxu0 %v1345_v42 }
 0x27c   :  { %1348 = vmatpush1.bf16.msra.mxu0 %v1347_v45 }
 0x27d   :  { %v772_v51 = vsel %vm770_vm12, %v1535_v49, %v1536_v48  ;;  %v1349_v52 = vpack.c.bf16 %v1536_v48, %v1496_v43 }
 0x27e   :  { %v1351_v53 = vpack.c.bf16 %v772_v51, %v771_v50 }
 0x27f   :  { %1350 = vmatprep.subr.bf16.mxu0 %v1349_v52 }
 0x280   :  { %1352 = vmatpush1.bf16.msra.mxu0 %v1351_v53 }
 0x281   :  { %1380 = vmatprep.subr.bf16.mxu0 %v1800_v57 }
 0x283   :  { %857 = vmatmul.mubr.f32.vlgmr.msra.gmra.mrb[8].mxu0 %v100_v54 }
 0x284   :  { %1230 = vmatprep.mubr.msk.f32.mxu0 %vm785_vm7, %v103_v55 }
 0x287   :  { %863 = vmatmul.mubr.f32.gmra.mrb[10].mxu0 %v102_v56 }
 0x288   :  { %v779_v32 = vpop.permute.xlu0 %778 }
 0x28b   :  { %v783_v63 = vpop.permute.xlu1 %782 }
 0x356   :  { %v858_v58 = vpop.f32.mrb[8].mxu0 }
 0x357   :  { %v859_v60 = vadd.f32 %v858_v58, %v779_v32  ;;  %v860_v61 = vpop.f32.mrb[9].mxu0 }
 0x358   :  { %v861_v62 = vadd.f32 %v860_v61, %v779_v32 }
 0x359   :  { %vm869_vm13 = vcmp.ge.f32.partialorder %v859_v60, 0.0  ;;  %v874_v3 = vmul.f32 %v873_v59, %v859_v60 }
 0x35a   :  { %vm870_vm14 = vcmp.ge.f32.partialorder %v861_v62, 0.0  ;;  %v875_v4 = vmul.f32 %v873_v59, %v861_v62  ;;  %v864_v7 = vpop.f32.mrb[10].mxu0 }
 0x35b   :  { %v878_v1 = vsel %vm869_vm13, %v859_v60, %v874_v3  ;;  %v865_v6 = vadd.f32 %v864_v7, %v783_v63  ;;  %v866_v9 = vpop.f32.mrb[11].mxu0 }
 0x35c   :  { %v879_v10 = vsel %vm870_vm14, %v861_v62, %v875_v4  ;;  %v867_v11 = vadd.f32 %v866_v9, %v783_v63 }
 0x35d   :  { %vm871_vm15 = vcmp.ge.f32.partialorder %v865_v6, 0.0  ;;  %v876_v31 = vmul.f32 %v873_v59, %v865_v6  ;;  %v1539_v0 = vpack.i.bf16 %v879_v10, %v878_v1 }
 0x35e   :  { %vm872_vm3 = vcmp.ge.f32.partialorder %v867_v11, 0.0  ;;  %v877_v5 = vmul.f32 %v873_v59, %v867_v11 }
 0x35f   :  { %v880_v35 = vsel %vm871_vm15, %v865_v6, %v876_v31  ;;  %1540 = vrot.lane.b32.xlu1 %v1539_v0, %s1787_s5 }
 0x360   :  { %v881_v12 = vsel %vm872_vm3, %v867_v11, %v877_v5  ;;  %v1354_v13 = vpack.c.bf16 %v880_v35, %v878_v1 }
 0x361   :  { %v1579_v17 = vpack.i.bf16 %v881_v12, %v880_v35 }
 0x362   :  { %1355 = vmatpush1.bf16.msra.mxu1 %v1354_v13 }
 0x363   :  { %1580 = vrot.lane.b32.xlu0 %v1579_v17, %s1787_s5  ;;  %1545 = vrot.lane.b32.xlu1 %v1539_v0, %s1794_s16 }
 0x364   :  { %1356 = vmatprep.subr.bf16.mxu1 %v1800_v57 }
 0x367   :  { %1585 = vrot.lane.b32.xlu0 %v1579_v17, %s1794_s16  ;;  %1550 = vrot.lane.b32.xlu1 %v1539_v0, %s1789_s14 }
 0x36b   :  { %1590 = vrot.lane.b32.xlu0 %v1579_v17, %s1789_s14  ;;  %1555 = vrot.lane.b32.xlu1 %v1539_v0, %s1790_s15 }
 0x36f   :  { %1595 = vrot.lane.b32.xlu0 %v1579_v17, %s1790_s15  ;;  %1560 = vrot.lane.b32.xlu1 %v1539_v0, %s1795_s17 }
 0x373   :  { %1600 = vrot.lane.b32.xlu0 %v1579_v17, %s1795_s17  ;;  %1565 = vrot.lane.b32.xlu1 %v1539_v0, %s1796_s18 }
 0x377   :  { %1605 = vrot.lane.b32.xlu0 %v1579_v17, %s1796_s18  ;;  %1570 = vrot.lane.b32.xlu1 %v1539_v0, %s1797_s2 }
 0x37b   :  { %1610 = vrot.lane.b32.xlu0 %v1579_v17, %s1797_s2  ;;  %1575 = vrot.lane.b32.xlu1 %v1539_v0, %s1798_s19 }
 0x37f   :  { %1615 = vrot.lane.b32.xlu0 %v1579_v17, %s1798_s19  ;;  %984 = vperm.xlu1 %1619, %v1958_v16  }
 0x383   :  { %989 = vperm.xlu0 %1620, %v1956_v15   ;;  %994 = vperm.xlu1 %1619, %v117_v21  }
 0x387   :  { %999 = vperm.xlu1 %1619, %v118_v34  }
 0x3d1   :  { %v1541_v24 = vpop.permute.xlu1 %1540 }
 0x3d2   :  { %v1543_v26 = vunpack.i.h.bf16 %v1541_v24  ;;  %v1542_v27 = vunpack.i.l.bf16 %v1541_v24 }
 0x3d4   :  { %v894_v2 = vsel %vm133_vm0, %v1542_v27, %v1543_v26 }
 0x3d5   :  { %v1581_v47 = vpop.permute.xlu0 %1580  ;;  %v1546_v29 = vpop.permute.xlu1 %1545 }
 0x3d6   :  { %v1583_v30 = vunpack.i.h.bf16 %v1581_v47  ;;  %v1582_v36 = vunpack.i.l.bf16 %v1581_v47  ;;  %v1548_v37 = vunpack.i.h.bf16 %v1546_v29  ;;  %v1547_v8 = vunpack.i.l.bf16 %v1546_v29 }
 0x3d8   :  { %v895_v22 = vsel %vm133_vm0, %v1582_v36, %v1583_v30  ;;  %v906_v28 = vsel %vm682_vm8, %v1547_v8, %v1548_v37  ;;  %v104_v8 = vld [vmem:[#allocation12 + $0x18] sm:$0xff]  ;;  %vm1802_vm0 = vmmov 0  }
 0x3d9   :  { %v1357_v16 = vpack.c.bf16 %v895_v22, %v894_v2  ;;  %v1586_v20 = vpop.permute.xlu0 %1585  ;;  %v1551_v15 = vpop.permute.xlu1 %1550  ;;  %1250 = vmatprep.mubr.msk.f32.mxu0 %vm1802_vm0, %v1788_v14 }
 0x3da   :  { %v1588_v23 = vunpack.i.h.bf16 %v1586_v20  ;;  %v1587_v25 = vunpack.i.l.bf16 %v1586_v20  ;;  %v1553_v38 = vunpack.i.h.bf16 %v1551_v15  ;;  %v1552_v39 = vunpack.i.l.bf16 %v1551_v15  ;;  %v106_v20 = vld [vmem:[#allocation12 + $0x50] sm:$0xff] }
 0x3db   :  { %1358 = vmatpush1.bf16.msra.mxu1 %v1357_v16  ;;  %v107_v16 = vld [vmem:[#allocation12 + $0x58] sm:$0xff]  ;;  %v109_v15 = vld [vmem:[#allocation12 + $0x90] sm:$0xff] }
 0x3dc   :  { %v907_v33 = vsel %vm682_vm8, %v1587_v25, %v1588_v23  ;;  %1359 = vmatprep.subr.bf16.mxu1 %v1800_v57  ;;  %v918_v45 = vsel %vm150_vm1, %v1552_v39, %v1553_v38  ;;  %v108_v23 = vld [vmem:[#allocation12 + $0x88] sm:$0xff]  ;;  %v1626_v38 = vld [vmem:[#allocation12 + $0x30] sm:$0xff] }
 0x3dd   :  { %v1360_v40 = vpack.c.bf16 %v907_v33, %v906_v28  ;;  %v1591_v41 = vpop.permute.xlu0 %1590  ;;  %v1556_v42 = vpop.permute.xlu1 %1555  ;;  %v111_v25 = vld [vmem:[#allocation12 + $0xc8] sm:$0xff]  ;;  %v110_v28 = vld [vmem:[#allocation12 + $0xc0] sm:$0xff]  ;;  %v1803_v33 = vmov 5  }
 0x3de   :  { %v1593_v43 = vunpack.i.h.bf16 %v1591_v41  ;;  %v1592_v44 = vunpack.i.l.bf16 %v1591_v41  ;;  %v1558_v48 = vunpack.i.h.bf16 %v1556_v42  ;;  %v1557_v49 = vunpack.i.l.bf16 %v1556_v42  ;;  %1621 = vset.pattern.permute.xlu0 %v1803_v33 }
 0x3df   :  { %1361 = vmatpush1.bf16.msra.mxu1 %v1360_v40  ;;  %1113 = vperm.xlu0 %1621, %v1626_v38  }
 0x3e0   :  { %v919_v46 = vsel %vm150_vm1, %v1592_v44, %v1593_v43  ;;  %1362 = vmatprep.subr.bf16.mxu1 %v1800_v57  ;;  %v930_v55 = vsel %vm167_vm2, %v1557_v49, %v1558_v48  ;;  %v1103_v43 = vstv %s1220_s21 }
 0x3e1   :  { %v1363_v50 = vpack.c.bf16 %v919_v46, %v918_v45  ;;  %v1596_v51 = vpop.permute.xlu0 %1595  ;;  %v1561_v52 = vpop.permute.xlu1 %1560 }
 0x3e2   :  { %v1598_v53 = vunpack.i.h.bf16 %v1596_v51  ;;  %v1597_v54 = vunpack.i.l.bf16 %v1596_v51  ;;  %v1563_v32 = vunpack.i.h.bf16 %v1561_v52  ;;  %v1562_v58 = vunpack.i.l.bf16 %v1561_v52 }
 0x3e3   :  { %1364 = vmatpush1.bf16.msra.mxu1 %v1363_v50 }
 0x3e4   :  { %v931_v56 = vsel %vm167_vm2, %v1597_v54, %v1598_v53  ;;  %1365 = vmatprep.subr.bf16.mxu1 %v1800_v57  ;;  %v942_v3 = vsel %vm725_vm9, %v1562_v58, %v1563_v32 }
 0x3e5   :  { %v1366_v59 = vpack.c.bf16 %v931_v56, %v930_v55  ;;  %v1601_v60 = vpop.permute.xlu0 %1600  ;;  %v1566_v61 = vpop.permute.xlu1 %1565 }
 0x3e6   :  { %v1603_v62 = vunpack.i.h.bf16 %v1601_v60  ;;  %v1602_v63 = vunpack.i.l.bf16 %v1601_v60  ;;  %v1568_v7 = vunpack.i.h.bf16 %v1566_v61  ;;  %v1567_v1 = vunpack.i.l.bf16 %v1566_v61 }
 0x3e7   :  { %1367 = vmatpush1.bf16.msra.mxu1 %v1366_v59 }
 0x3e8   :  { %v943_v4 = vsel %vm725_vm9, %v1602_v63, %v1603_v62  ;;  %1368 = vmatprep.subr.bf16.mxu1 %v1800_v57  ;;  %v954_v0 = vsel %vm740_vm10, %v1567_v1, %v1568_v7  ;;  %v112_v7 = vld [vmem:[#allocation12 + $0x28] sm:$0xff] }
 0x3e9   :  { %v1369_v6 = vpack.c.bf16 %v943_v4, %v942_v3  ;;  %v1606_v9 = vpop.permute.xlu0 %1605  ;;  %v1571_v10 = vpop.permute.xlu1 %1570 }
 0x3ea   :  { %v1608_v11 = vunpack.i.h.bf16 %v1606_v9  ;;  %v1607_v31 = vunpack.i.l.bf16 %v1606_v9  ;;  %v1573_v35 = vunpack.i.h.bf16 %v1571_v10  ;;  %v1572_v12 = vunpack.i.l.bf16 %v1571_v10 }
 0x3eb   :  { %1370 = vmatpush1.bf16.msra.mxu1 %v1369_v6 }
 0x3ec   :  { %v955_v5 = vsel %vm740_vm10, %v1607_v31, %v1608_v11  ;;  %1371 = vmatprep.subr.bf16.mxu1 %v1800_v57  ;;  %v966_v34 = vsel %vm755_vm11, %v1572_v12, %v1573_v35 }
 0x3ed   :  { %v1372_v13 = vpack.c.bf16 %v955_v5, %v954_v0  ;;  %v1611_v17 = vpop.permute.xlu0 %1610  ;;  %v1576_v18 = vpop.permute.xlu1 %1575 }
 0x3ee   :  { %v1613_v19 = vunpack.i.h.bf16 %v1611_v17  ;;  %v1612_v21 = vunpack.i.l.bf16 %v1611_v17  ;;  %v1578_v26 = vunpack.i.h.bf16 %v1576_v18  ;;  %v1577_v27 = vunpack.i.l.bf16 %v1576_v18 }
 0x3ef   :  { %1373 = vmatpush1.bf16.msra.mxu1 %v1372_v13 }
 0x3f0   :  { %v967_v24 = vsel %vm755_vm11, %v1612_v21, %v1613_v19  ;;  %1374 = vmatprep.subr.bf16.mxu1 %v1800_v57  ;;  %v978_v2 = vsel %vm770_vm12, %v1577_v27, %v1578_v26 }
 0x3f1   :  { %v1375_v47 = vpack.c.bf16 %v967_v24, %v966_v34  ;;  %v1616_v29 = vpop.permute.xlu0 %1615 }
 0x3f2   :  { %v1618_v30 = vunpack.i.h.bf16 %v1616_v29  ;;  %v1617_v36 = vunpack.i.l.bf16 %v1616_v29 }
 0x3f3   :  { %1376 = vmatpush1.bf16.msra.mxu1 %v1375_v47 }
 0x3f4   :  { %v979_v22 = vsel %vm770_vm12, %v1617_v36, %v1618_v30  ;;  %1377 = vmatprep.subr.bf16.mxu1 %v1800_v57 }
 0x3f5   :  { %v1378_v37 = vpack.c.bf16 %v979_v22, %v978_v2 }
 0x3f7   :  { %1379 = vmatpush1.bf16.msra.mxu1 %v1378_v37 }
 0x3fa   :  { %1079 = vmatmul.mubr.f32.vlgmr.msra.gmra.mrb[8].mxu1 %v104_v8 }
 0x3fb   :  { %1232 = vmatprep.mubr.msk.f32.mxu1 %vm785_vm7, %v107_v16 }
 0x3fe   :  { %1084 = vmatmul.mubr.f32.gmra.mrb[10].mxu1 %v106_v20  ;;  %v985_v39 = vpop.permute.xlu1 %984 }
 0x3ff   :  { %1233 = vmatprep.mubr.msk.f32.mxu1 %vm785_vm7, %v109_v15 }
 0x402   :  { %1089 = vmatmul.mubr.f32.gmra.mrb[12].mxu1 %v108_v23  ;;  %v990_v44 = vpop.permute.xlu0 %989  ;;  %v995_v50 = vpop.permute.xlu1 %994 }
 0x403   :  { %1234 = vmatprep.mubr.msk.f32.mxu1 %vm785_vm7, %v111_v25 }
 0x406   :  { %1094 = vmatmul.mubr.f32.gmra.mrb[14].mxu1 %v110_v28  ;;  %v1000_v32 = vpop.permute.xlu1 %999 }
 0x45e   :  { %v1114_v1 = vpop.permute.xlu0 %1113 }
 0x4cd   :  { %v1080_v40 = vpop.f32.mrb[8].mxu1 }
 0x4ce   :  { %v1081_v41 = vadd.f32 %v1080_v40, %v985_v39  ;;  %v1082_v42 = vpop.f32.mrb[9].mxu1 }
 0x4d0   :  { %v1104_v46 = vmul.f32 %v1103_v43, %v1081_v41  ;;  %vm1099_vm1 = vcmp.ge.f32.partialorder %v1081_v41, 0.0 }
 0x4d1   :  { %v1085_v45 = vpop.f32.mrb[10].mxu1 }
 0x4d2   :  { %v1086_v48 = vadd.f32 %v1085_v45, %v990_v44  ;;  %v1087_v49 = vpop.f32.mrb[11].mxu1  ;;  %v1108_v52 = vsel %vm1099_vm1, %v1081_v41, %v1104_v46 }
 0x4d4   :  { %vm1100_vm2 = vcmp.ge.f32.partialorder %v1086_v48, 0.0  ;;  %v1105_v51 = vmul.f32 %v1103_v43, %v1086_v48 }
 0x4d5   :  { %v1090_v14 = vpop.f32.mrb[12].mxu1 }
 0x4d6   :  { %v1109_v53 = vsel %vm1100_vm2, %v1086_v48, %v1105_v51  ;;  %v1091_v54 = vadd.f32 %v1090_v14, %v995_v50  ;;  %v1092_v55 = vpop.f32.mrb[13].mxu1 }
 0x4d7   :  { %v1381_v56 = vpack.c.bf16 %v1109_v53, %v1108_v52 }
 0x4d8   :  { %v1106_v59 = vmul.f32 %v1103_v43, %v1091_v54  ;;  %vm1101_vm4 = vcmp.ge.f32.partialorder %v1091_v54, 0.0 }
 0x4d9   :  { %v1095_v58 = vpop.f32.mrb[14].mxu1  ;;  %1382 = vmatpush3.bf16.msra.mxu0 %v1381_v56 }
 0x4da   :  { %v1096_v60 = vadd.f32 %v1095_v58, %v1000_v32  ;;  %v1097_v61 = vpop.f32.mrb[15].mxu1  ;;  %1383 = vmatprep.subr.bf16.mxu0 %v1800_v57  ;;  %v1110_v63 = vsel %vm1101_vm4, %v1091_v54, %v1106_v59  ;;  %v1190_v57 = vlaneseq }
 0x4dc   :  { %vm1102_vm5 = vcmp.ge.f32.partialorder %v1096_v60, 0.0  ;;  %v1107_v62 = vmul.f32 %v1103_v43, %v1096_v60  ;;  %v1191_v5 = vshrl.u32 %v1190_v57, 7 }
 0x4de   :  { %v1111_v3 = vsel %vm1102_vm5, %v1096_v60, %v1107_v62  ;;  %vm1192_vm7 = vcmp.eq.s32.totalorder %v1191_v5, 0 }
 0x4df   :  { %v1384_v4 = vpack.c.bf16 %v1111_v3, %v1110_v63 }
 0x4e1   :  { %1385 = vmatpush3.bf16.msra.mxu0 %v1384_v4 }
 0x4e4   :  { %1251 = vmatmul.mubr.msk.f32.vlgmr.msra.gmra.mrb[12].mxu0 %vm1116_vm6, %v112_v7 }
 0x5b7   :  { %v1186_v6 = vpop.f32.mrb[12].mxu0 }
 0x5b8   :  { %v1187_v9 = vadd.f32 %v1186_v6, %v1114_v1  ;;  %v1252_v10 = vpop.f32.mrb[13].mxu0 }
 0x5ba   :  { %v1236_v11 = vmul.f32 -1.442695, %v1187_v9 }
 0x5bc   :  { %1622 = vpow2.f32 %v1236_v11 }
 0x5c6   :  { %v1623_v31 = vpop.eup %1622 }
 0x5c7   :  { %v1196_v0 = vadd.f32 1.0, %v1623_v31 }
 0x5c9   :  { %1624 = vrcp.f32 %v1196_v0 }
 0x5d3   :  { %v1625_v35 = vpop.eup %1624 }
 0x5d4   :  { %v1199_v12 = vsel %vm1192_vm7, %v1625_v35, %v1187_v9 }
 0x5d5   :  { %1200 = vst [vmem:[#allocation13] sm:$0xff] %v1199_v12 }
 0x5d6   :  { %1758 = shalt.err (!%p1755_p5)
}
 0x5d7   :  { %s1759_s27 = scalar_lea.hbm %s2243_s6, 128 }
 0x5d8   :  { %p1760_p6 = scmp.ne.s32.totalorder %s2243_s6, %s1759_s27  ;;  %p1763_p7 = scmp.lt.u32.totalorder %s1759_s27, %s2243_s6 }
 0x5da   :  { %p1765_p8 = pnand %p1763_p7, %p1760_p6 }
 0x5dc   :  { %1768 = shalt.err (!%p1765_p8)
}
 0x5dd   :  { %1210 = dma.vmem_to_hbm [thread:$0]  %s1208_s23, 128, %s2243_s6, [#allocation4]  }
 0x5de   :  { %1777 = dma.done.wait [#allocation4], 128  }
 0x5df   :  { %1778 = vsyncadd [#allocation4], 4294967168 }
 0x5e0   :  { %1214 = vsyncpa [#allocation3], 1 }
 0x5e1   :  { %1215 = vsyncpa [#allocation8], 1 }
 0x5e2   :  { %1216 = vsyncpa [#allocation11], 1 }
 0x5e3   :  { %1217 = vsyncpa [#allocation4], 1 }
 0x5e4   :  { %1218 = vsyncpa [#allocation5], 1 }

</bundles_post_ra>
